<compile_context>
chip_gen: v5e
topology: v5e:2x2
jax: 0.10.0
libtpu: 0.0.40
codegen_flags: <defaults>
</compile_context>

<pallas_src>
import functools

import jax
import jax.numpy as jnp
from jax.experimental import pallas as pl
from jax.experimental.pallas import tpu as pltpu


def _round_up(x, m):
    return (x + m - 1) // m * m


# Tile sizes: 256-row output tiles (parallel axis), 512-wide contraction tiles
# over neighbor nodes.  At bf16 this is ~1.3 MiB of double-buffered VMEM per
# layer call -> fits well inside the 16/32 MiB scoped-VMEM defaults of
# v5e / v6e / v7x, and 128-aligned tiles match all MXU generations.
_TM = 256
_TK = 512


def sage_kernel(x_self_ref, a_ref, x_nbr_ref, w_ref, b_ref, o_ref, acc_ref,
                *, apply_relu):
    """One SAGEConv layer, tiled over (row tile i, neighbor tile k)."""
    k = pl.program_id(1)

    @pl.when(k == 0)
    def _():
        acc_ref[...] = jnp.zeros_like(acc_ref)

    # Mean aggregation: acc[i, :] += A_norm[i, k] @ x[k, :]   (f32 accumulate)
    acc_ref[...] += jnp.dot(a_ref[...], x_nbr_ref[...],
                            preferred_element_type=jnp.float32)

    @pl.when(k == pl.num_programs(1) - 1)
    def _():
        # Fused projection: [agg | x_self] @ [W_l.T ; W_r.T]  (single MXU call,
        # K = 2*Cp), then f32 bias add (+ ReLU) on the VPU.
        agg = acc_ref[...].astype(x_self_ref.dtype)
        cat = jnp.concatenate([agg, x_self_ref[...]], axis=-1)      # [tm, 2*Cp]
        out = jnp.dot(cat, w_ref[...], preferred_element_type=jnp.float32)
        out = out + b_ref[...]                                      # bias kept f32
        if apply_relu:
            out = jnp.maximum(out, 0.0)
        o_ref[...] = out.astype(o_ref.dtype)


def sage_layer(x, a_norm, w_stacked, bias, *, apply_relu, out_dtype, tm, tk):
    n_pad, cp = x.shape
    grid = (n_pad // tm, n_pad // tk)
    kern = functools.partial(sage_kernel, apply_relu=apply_relu)
    return pl.pallas_call(
        kern,
        out_shape=jax.ShapeDtypeStruct((n_pad, cp), out_dtype),
        grid_spec=pltpu.PrefetchScalarGridSpec(
            num_scalar_prefetch=0,
            grid=grid,
            in_specs=[
                pl.BlockSpec((tm, cp), lambda i, k: (i, 0)),      # x rows (root/self)
                pl.BlockSpec((tm, tk), lambda i, k: (i, k)),      # A_norm tile
                pl.BlockSpec((tk, cp), lambda i, k: (k, 0)),      # x rows (neighbors)
                pl.BlockSpec((2 * cp, cp), lambda i, k: (0, 0)),  # [W_l.T ; W_r.T]
                pl.BlockSpec((1, cp), lambda i, k: (0, 0)),       # bias (f32)
            ],
            out_specs=pl.BlockSpec((tm, cp), lambda i, k: (i, 0)),
            scratch_shapes=[pltpu.VMEM((tm, cp), jnp.float32)],
        ),
        compiler_params=pltpu.CompilerParams(
            dimension_semantics=("parallel", "arbitrary"),
            vmem_limit_bytes=32 * 1024 * 1024,
        ),
    )(x, a_norm, x, w_stacked, bias)


def build_norm_adj(edge_index, num_nodes):
    """Dense row-normalized adjacency: A_norm @ x == scatter_mean(x[src] -> dst)."""
    src = edge_index[0]
    dst = edge_index[1]
    a = jnp.zeros((num_nodes, num_nodes), jnp.float32).at[dst, src].add(1.0)
    deg = jnp.sum(a, axis=1, keepdims=True)
    return a / jnp.maximum(deg, 1.0)


def gnn_forward(x, edge_index, params, *, compute_dtype=jnp.bfloat16):
    n, c = x.shape
    cp = _round_up(c, 128)                # lane-dense feature dim
    n_pad = _round_up(n, max(_TM, _TK))   # rows divisible by both tile sizes

    a = build_norm_adj(edge_index, n)
    a = jnp.pad(a, ((0, n_pad - n), (0, n_pad - n))).astype(compute_dtype)
    xp = jnp.pad(x, ((0, n_pad - n), (0, cp - c))).astype(compute_dtype)

    def pack(w_l, w_r, b):
        # Host-side transpose + zero-pad + stack so the kernel does
        # y = [agg | x] @ [W_l.T ; W_r.T] + b   with no in-kernel transposes.
        w_lt = jnp.pad(w_l.T, ((0, cp - c), (0, cp - c)))
        w_rt = jnp.pad(w_r.T, ((0, cp - c), (0, cp - c)))
        w = jnp.concatenate([w_lt, w_rt], axis=0).astype(compute_dtype)
        bp = jnp.pad(b, ((0, 0), (0, cp - c))).astype(jnp.float32)
        return w, bp

    w1, b1 = pack(params["w1_l"], params["w1_r"], params["b1_l"])
    w2, b2 = pack(params["w2_l"], params["w2_r"], params["b2_l"])

    h = sage_layer(xp, a, w1, b1, apply_relu=True,
                   out_dtype=compute_dtype, tm=_TM, tk=_TK)
    out = sage_layer(h, a, w2, b2, apply_relu=False,
                     out_dtype=jnp.float32, tm=_TM, tk=_TK)
    return out[:n, :c]


def init_params(key, hidden_channels):
    """Deterministic synthetic weights, torch-Linear-like uniform init."""
    c = hidden_channels
    ks = jax.random.split(key, 6)
    bound = 1.0 / (c ** 0.5)

    def u(k, shape):
        return jax.random.uniform(k, shape, jnp.float32, -bound, bound)

    return {
        "w1_l": u(ks[0], (c, c)),
        "b1_l": u(ks[1], (1, c)),   # kept 2D for TPU-friendly layout
        "w1_r": u(ks[2], (c, c)),
        "w2_l": u(ks[3], (c, c)),
        "b2_l": u(ks[4], (1, c)),
        "w2_r": u(ks[5], (c, c)),
    }


def reference_forward(x, edge_index, params):
    """Pure-JAX reference of the PyG SAGEConv semantics (scatter mean)."""
    n = x.shape[0]
    src, dst = edge_index[0], edge_index[1]

    def sage(x_in, w_l, b_l, w_r):
        summed = jnp.zeros_like(x_in).at[dst].add(x_in[src])
        cnt = jnp.zeros((n, 1), jnp.float32).at[dst].add(1.0)
        agg = summed / jnp.maximum(cnt, 1.0)
        return agg @ w_l.T + b_l + x_in @ w_r.T

    h = jax.nn.relu(sage(x, params["w1_l"], params["b1_l"], params["w1_r"]))
    return sage(h, params["w2_l"], params["b2_l"], params["w2_r"])


if __name__ == "__main__":
    hidden_channels = 32
    num_nodes = 16
    num_edges = 48

    key = jax.random.PRNGKey(0)
    k_x, k_e, k_p = jax.random.split(key, 3)

    x = jax.random.normal(k_x, (num_nodes, hidden_channels), jnp.float32)
    edge_index = jax.random.randint(k_e, (2, num_edges), 0, num_nodes, jnp.int32)
    params = init_params(k_p, hidden_channels)

    ref = reference_forward(x, edge_index, params)

    # f32 compute path: exact-semantics check against the pure-JAX reference.
    out_f32 = jax.block_until_ready(
        gnn_forward(x, edge_index, params, compute_dtype=jnp.float32))
    assert out_f32.shape == (num_nodes, hidden_channels)
    assert jnp.allclose(out_f32, ref, atol=1e-4, rtol=1e-4), "f32 mismatch vs reference"

    # bf16-MXU / f32-accumulate path: the performance configuration (v6e/v7x).
    out_bf16 = jax.block_until_ready(
        gnn_forward(x, edge_index, params, compute_dtype=jnp.bfloat16))
    assert out_bf16.shape == (num_nodes, hidden_channels)
    assert jnp.allclose(out_bf16, ref, atol=1e-1, rtol=1e-1), "bf16 mismatch vs reference"

    print("KERNEL_OK")
</pallas_src>

<mosaic_0001>
module attributes {stable_mosaic.version = 11 : i64} {
  func.func @sage_kernel(%arg0: i32, %arg1: i32, %arg2: memref<256x128xf32, #tpu.memory_space<vmem>>, %arg3: memref<256x512xf32, #tpu.memory_space<vmem>>, %arg4: memref<512x128xf32, #tpu.memory_space<vmem>>, %arg5: memref<256x128xf32, #tpu.memory_space<vmem>>, %arg6: memref<1x128xf32, #tpu.memory_space<vmem>>, %arg7: memref<256x128xf32, #tpu.memory_space<vmem>>, %arg8: memref<256x128xf32, #tpu.memory_space<vmem>>) attributes {dimension_semantics = [#tpu.dimension_semantics<parallel>, #tpu.dimension_semantics<arbitrary>], iteration_bounds = array<i64: 2, 1>, scalar_prefetch = 0 : i64, scratch_operands = 1 : i64, tpu.core_type = #tpu.core_type<tc>, window_params = [{transform_indices = @transform_0, window_bounds = array<i64: 256, 128>}, {transform_indices = @transform_1, window_bounds = array<i64: 256, 512>}, {transform_indices = @transform_2, window_bounds = array<i64: 512, 128>}, {pipeline_mode = #tpu.pipeline_mode<synchronous>, transform_indices = @transform_3, window_bounds = array<i64: 256, 128>}, {pipeline_mode = #tpu.pipeline_mode<synchronous>, transform_indices = @transform_4, window_bounds = array<i64: 1, 128>}, {transform_indices = @transform_5, window_bounds = array<i64: 256, 128>}]} {
    %c0_i32 = arith.constant 0 : i32
    %0 = arith.cmpi eq, %arg1, %c0_i32 : i32
    %1 = arith.extui %0 : i1 to i32
    %c0_i32_0 = arith.constant 0 : i32
    %2 = arith.cmpi ne, %1, %c0_i32_0 : i32
    scf.if %2 {
      %cst_10 = arith.constant 0.000000e+00 : f32
      %12 = vector.broadcast %cst_10 : f32 to vector<256x128xf32>
      %c0_11 = arith.constant 0 : index
      %c0_12 = arith.constant 0 : index
      %13 = vector.load %arg8[%c0_11, %c0_12] : memref<256x128xf32, #tpu.memory_space<vmem>>, vector<256x128xf32>
      tpu.vector_store %arg8[%c0_11, %c0_12], %12 {strides = array<i32>} : memref<256x128xf32, #tpu.memory_space<vmem>>, vector<256x128xf32>,
    } else {
    }
    %c0 = arith.constant 0 : index
    %c0_1 = arith.constant 0 : index
    %3 = vector.load %arg8[%c0, %c0_1] : memref<256x128xf32, #tpu.memory_space<vmem>>, vector<256x128xf32>
    %c0_2 = arith.constant 0 : index
    %c0_3 = arith.constant 0 : index
    %4 = vector.load %arg3[%c0_2, %c0_3] : memref<256x512xf32, #tpu.memory_space<vmem>>, vector<256x512xf32>
    %c0_4 = arith.constant 0 : index
    %c0_5 = arith.constant 0 : index
    %5 = vector.load %arg4[%c0_4, %c0_5] : memref<512x128xf32, #tpu.memory_space<vmem>>, vector<512x128xf32>
    %cst = arith.constant dense<0.000000e+00> : vector<256x128xf32>
    %6 = tpu.matmul %4, %5, %cst {dimension_numbers = #tpu.dot_dimension_numbers<[1], [0], [0], [1], [0, 0, 1, 1], [], []>} : vector<256x512xf32>, vector<512x128xf32>, vector<256x128xf32> -> vector<256x128xf32>
    %7 = arith.addf %3, %6 : vector<256x128xf32>
    %c0_6 = arith.constant 0 : index
    %c0_7 = arith.constant 0 : index
    %8 = vector.load %arg8[%c0_6, %c0_7] : memref<256x128xf32, #tpu.memory_space<vmem>>, vector<256x128xf32>
    tpu.vector_store %arg8[%c0_6, %c0_7], %7 {strides = array<i32>} : memref<256x128xf32, #tpu.memory_space<vmem>>, vector<256x128xf32>,
    %c0_i32_8 = arith.constant 0 : i32
    %9 = arith.cmpi eq, %arg1, %c0_i32_8 : i32
    %10 = arith.extui %9 : i1 to i32
    %c0_i32_9 = arith.constant 0 : i32
    %11 = arith.cmpi ne, %10, %c0_i32_9 : i32
    scf.if %11 {
      %c0_10 = arith.constant 0 : index
      %c0_11 = arith.constant 0 : index
      %12 = vector.load %arg8[%c0_10, %c0_11] : memref<256x128xf32, #tpu.memory_space<vmem>>, vector<256x128xf32>
      %c0_12 = arith.constant 0 : index
      %c0_13 = arith.constant 0 : index
      %13 = vector.load %arg2[%c0_12, %c0_13] : memref<256x128xf32, #tpu.memory_space<vmem>>, vector<256x128xf32>
      %14 = tpu.concatenate %12, %13 in 1 : vector<256x128xf32>, vector<256x128xf32> -> vector<256x256xf32>
      %c0_14 = arith.constant 0 : index
      %c0_15 = arith.constant 0 : index
      %15 = vector.load %arg5[%c0_14, %c0_15] : memref<256x128xf32, #tpu.memory_space<vmem>>, vector<256x128xf32>
      %cst_16 = arith.constant dense<0.000000e+00> : vector<256x128xf32>
      %16 = tpu.matmul %14, %15, %cst_16 {dimension_numbers = #tpu.dot_dimension_numbers<[1], [0], [0], [1], [0, 0, 1, 1], [], []>} : vector<256x256xf32>, vector<256x128xf32>, vector<256x128xf32> -> vector<256x128xf32>
      %c0_17 = arith.constant 0 : index
      %c0_18 = arith.constant 0 : index
      %17 = vector.load %arg6[%c0_17, %c0_18] : memref<1x128xf32, #tpu.memory_space<vmem>>, vector<1x128xf32>
      %18 = vector.broadcast %17 : vector<1x128xf32> to vector<256x128xf32>
      %19 = arith.addf %16, %18 : vector<256x128xf32>
      %cst_19 = arith.constant 0.000000e+00 : f32
      %20 = vector.broadcast %cst_19 : f32 to vector<256x128xf32>
      %21 = arith.maximumf %19, %20 : vector<256x128xf32>
      %c0_20 = arith.constant 0 : index
      %c0_21 = arith.constant 0 : index
      %22 = vector.load %arg7[%c0_20, %c0_21] : memref<256x128xf32, #tpu.memory_space<vmem>>, vector<256x128xf32>
      tpu.vector_store %arg7[%c0_20, %c0_21], %21 {strides = array<i32>} : memref<256x128xf32, #tpu.memory_space<vmem>>, vector<256x128xf32>,
    } else {
    }
    return
  }
  func.func @transform_0(%arg0: i32, %arg1: i32) -> (i32, i32) {
    %c0_i32 = arith.constant 0 : i32
    %c0_i32_0 = arith.constant 0 : i32
    return %arg0, %c0_i32 : i32, i32
  }
  func.func @transform_1(%arg0: i32, %arg1: i32) -> (i32, i32) {
    %c0_i32 = arith.constant 0 : i32
    return %arg0, %arg1 : i32, i32
  }
  func.func @transform_2(%arg0: i32, %arg1: i32) -> (i32, i32) {
    %c0_i32 = arith.constant 0 : i32
    %c0_i32_0 = arith.constant 0 : i32
    return %arg1, %c0_i32 : i32, i32
  }
  func.func @transform_3(%arg0: i32, %arg1: i32) -> (i32, i32) {
    %c0_i32 = arith.constant 0 : i32
    %c0_i32_0 = arith.constant 0 : i32
    %c0_i32_1 = arith.constant 0 : i32
    return %c0_i32, %c0_i32_0 : i32, i32
  }
  func.func @transform_4(%arg0: i32, %arg1: i32) -> (i32, i32) {
    %c0_i32 = arith.constant 0 : i32
    %c0_i32_0 = arith.constant 0 : i32
    %c0_i32_1 = arith.constant 0 : i32
    return %c0_i32, %c0_i32_0 : i32, i32
  }
  func.func @transform_5(%arg0: i32, %arg1: i32) -> (i32, i32) {
    %c0_i32 = arith.constant 0 : i32
    %c0_i32_0 = arith.constant 0 : i32
    return %arg0, %c0_i32 : i32, i32
  }
}

</mosaic_0001>

<bundles_post_ra>
// kernel: tpu_custom_call.1
= control target key start
LH: loop header
LB: loop body
LE: loop exit
PB: predicated region body
PF: predicated region fallthrough
CT: control target
= control target key end

     0   :  { %s2542_s0 = inlined_call_operand.hbm [shape: f32[512,128], index: 0, kind: input, shape index: {}]   ;;  %s2543_s1 = inlined_call_operand.hbm [shape: f32[512,512], index: 1, kind: input, shape index: {}]   ;;  %s2544_s2 = inlined_call_operand.hbm [shape: f32[512,128], index: 2, kind: input, shape index: {}]   ;;  %s2545_s3 = inlined_call_operand.hbm [shape: f32[256,128], index: 3, kind: input, shape index: {}]   ;;  %s2546_s4 = inlined_call_operand.vmem [shape: f32[1,128], index: 4, kind: input, shape index: {}]   ;;  %s2547_s5 = inlined_call_operand.hbm [shape: f32[512,128], index: 5, kind: output, shape index: {}]  }
   0x1   :  { %2554 = sst [smem:[#allocation21_spill]] %s2542_s0 }
   0x2   :  { %2555 = sst [smem:[#allocation22_spill]] %s2544_s2 }
   0x3   :  { %2556 = sst [smem:[#allocation23_spill]] %s2545_s3 }
   0x4   :  { %10 = vsyncpa [#allocation4], 0 }
   0x5   :  { %12 = vsyncpa [#allocation4 + $0x1], 0 }
   0x6   :  { %13 = vsyncpa [#allocation7], 0 }
   0x7   :  { %15 = vsyncpa [#allocation7 + $0x1], 0 }
   0x8   :  { %16 = vsyncpa [#allocation10], 0 }
   0x9   :  { %17 = vsyncpa [#allocation5], 0 }
   0xa   :  { %19 = vsyncpa [#allocation5 + $0x1], 0  ;;  %s2072_s18 = smov 0   ;;  %s2074_s19 = smov 0  }
   0xb   :  { %s2076_s20 = smov 0   ;;  %s2078_s21 = smov 0  }
   0xc   :  { %s2080_s22 = smov 0   ;;  %s2082_s23 = smov 0  }
   0xd LB: > { %2557 = sst [smem:[#allocation17_spill]] %s2020_s20  ;;  %s2103_s24 = sadd.s32 4294967295, %s2032_s23   ;;  %s2032_s23 = sphi %s2082_s23, %s25_s23   ;;  %s2028_s22 = sphi %s2080_s22, %s2579_s22   ;;  %s2024_s21 = sphi %s2078_s21, %s2578_s21   ;;  %s2020_s20 = sphi %s2076_s20, %s2574_s20   ;;  %s2016_s19 = sphi %s2074_s19, %s2577_s19   ;;  %s2012_s18 = sphi %s2072_s18, %s2576_s18  }
   0xe   : > { %2558 = sst [smem:[#allocation18_spill]] %s2032_s23  ;;  %s1664_s25 = sadd.s32 4294967294, %s2032_s23  }
   0xf   : > { %p57_p0 = scmp.ne.s32.totalorder %s2016_s19, %s2012_s18  ;;  %p58_p1 = scmp.eq.s32.totalorder %s2103_s24, 0 }
  0x10   : > { %p177_p2 = scmp.eq.s32.totalorder %s2103_s24, 1  ;;  %p183_p3 = scmp.eq.s32.totalorder %s1664_s25, 1 }
  0x11   : > { %p2112_p4 = por %p58_p1, %p57_p0  ;;  %p1665_p5 = scmp.ge.s32.totalorder %s2032_s23, 1 }
  0x12   : > { %p2117_p6 = por %p183_p3, %p57_p0  ;;  %p190_p7 = scmp.lt.s32.totalorder %s2032_s23, 3 }
  0x13   : > { %s2561_s2 = sld [smem:[#allocation22_spill]]  ;;  %s2034_s7 = smov [#allocation8]  }
  0x14   : > { %p2125_p8 = pnand %p1665_p5, %p190_p7  ;;  %s206_s8 = sshll.u32 %s2034_s7, 4  ;;  %s207_s8 = int_to_ptr.vmem [resolvable:$true] %s206_s8 }
  0x15   : > { %p1668_p11 = scmp.ge.s32.totalorder %s2032_s23, 2  ;;  %s2563_s3 = sld [smem:[#allocation23_spill]] }
  0x16   : > { %p1737_p9 = pneg %p2125_p8  ;;  %s2548_s12 = smov 128  }
  0x17   : > { %s2549_s13 = smov 8   ;;  %s2037_s14 = smov [#allocation9]  }
  0x18   : > { %p1738_p10 = pnand %p1737_p9, %p58_p1  ;;  %s220_s15 = sshll.u32 %s2037_s14, 4  ;;  %s221_s15 = int_to_ptr.vmem [resolvable:$true] %s220_s15 }
  0x19   : > { %s204_s30 = sshll.u32 %s2561_s2, 4  ;;  %s37_s16 = sadd.s32 1, %s2028_s22  ;;  %s205_s30 = int_to_ptr.hbm [resolvable:$true] %s204_s30 }
  0x1a   : > { %1740 = dma.hbm_to_vmem [thread:$0]  (!%p1738_p10), %s205_s30, 8192, %s207_s8, [#allocation7], %s2548_s12, %s2548_s12, %s2549_s13  }
  0x1b   : > { %s218_s11 = sshll.u32 %s2563_s3, 4  ;;  %s44_s17 = sadd.s32 1, %s2020_s20  ;;  %s219_s11 = int_to_ptr.hbm [resolvable:$true] %s218_s11 }
  0x1c   : > { %1743 = dma.hbm_to_vmem [thread:$0]  (!%p1738_p10), %s219_s11, 4096, %s221_s15, [#allocation10], %s2548_s12, %s2548_s12, %s2549_s13  }
  0x1d   : > { %p39_p12 = scmp.ge.s32.totalorder %s37_s16, 2  ;;  %p51_p13 = scmp.ne.s32.totalorder %s2020_s20, %s2016_s19 }
  0x1e   : > { %p52_p0 = scmp.eq.s32.totalorder %s2032_s23, 0  ;;  %p1757_p3 = scmp.lt.s32.totalorder %s2032_s23, 2 }
  0x1f   : > { %s2581_s16 = smov (%p39_p12, %s37_s16), 0  ;;  %p2157_p7 = por %p177_p2, %p51_p13 }
  0x20   : > { %2564 = sst [smem:[#allocation19_spill]] %s2581_s16  ;;  %p2151_p5 = por %p52_p0, %p51_p13 }
  0x21   : > { %s41_s29 = ssub.s32 %s2028_s22, %s2581_s16  ;;  %s237_s30 = sand.u32 1, %s2020_s20  }
  0x22   : > { %p42_p9 = scmp.eq.s32.totalorder %s41_s29, 0  ;;  %s1669_s7 = sshll.u32 %s237_s30, 8 }
  0x23   : > { %s1687_s8 = sshll.u32 %s2028_s22, 8  ;;  %s2568_s0 = sld [smem:[#allocation21_spill]] }
  0x24   : > { %s2166_s9 = scalar_select %p42_p9, %s2020_s20, %s44_s17  }
  0x25   : > { %s241_s12 = scalar_lea.vmem [#allocation3], %s1669_s7  ;;  %p2175_p2 = pnand %p1757_p3, %p2151_p5 }
  0x26   : > { %2567 = sst [smem:[#allocation20_spill]] %s2166_s9  ;;  %s249_s13 = sshll.u32 %s241_s12, 4  ;;  %s250_s13 = int_to_ptr.vmem [resolvable:$true] %s249_s13 }
  0x27   : > { %s259_s29 = sand.u32 1, %s2032_s23   ;;  %s1672_s17 = sshll.u32 %s237_s30, 10 }
  0x28   : > { %s238_s3 = scalar_lea.sflag [#allocation4], %s237_s30  ;;  %s2570_s16 = smov 8  }
  0x29   : > { %s246_s14 = scalar_lea.hbm %s2568_s0, %s1687_s8  ;;  %s2571_s10 = smov 128  }
  0x2a   : > { %s247_s15 = sshll.u32 %s246_s14, 4  ;;  %s1689_s7 = sshll.u32 %s2028_s22, 10  ;;  %s248_s15 = int_to_ptr.hbm [resolvable:$true] %s247_s15 }
  0x2b   : > { %1747 = dma.hbm_to_vmem [thread:$0]  (!%p2175_p2), %s248_s15, 4096, %s250_s13, %s238_s3, %s2571_s10, %s2571_s10, %s2570_s16  }
  0x2c   : > { %s263_s12 = scalar_lea.vmem [#allocation6], %s1672_s17  ;;  %s271_s14 = scalar_lea.hbm %s2543_s1, %s1689_s7 }
  0x2d   : > { %s274_s8 = sshll.u32 %s263_s12, 4  ;;  %s272_s0 = sshll.u32 %s271_s14, 4  ;;  %s275_s8 = int_to_ptr.vmem [resolvable:$true] %s274_s8  ;;  %s273_s0 = int_to_ptr.hbm [resolvable:$true] %s272_s0 }
  0x2e   : > { %s260_s9 = scalar_lea.sflag [#allocation7], %s259_s29  ;;  %s2038_s20 = smov 512  }
  0x2f   : > { %s2039_s23 = smov 32   ;;  %286 = sbr.rel (%p2125_p8) target bundleno = 740 (0x2e4), region = 40 }
  0x30   : > { %1750 = dma.hbm_to_vmem [thread:$0]  (!%p2175_p2), %s273_s0, 16384, %s275_s8, %s260_s9, %s2038_s20, %s2038_s20, %s2039_s23  }
  0x31   : > { %s2194_s3 = sand.u32 (!%p2125_p8), 1, %s2016_s19  }
  0x32   : > { %s1677_s13 = sshll.u32 (!%p2125_p8), %s2194_s3, 8  ;;  %s289_s16 = scalar_lea.sflag (!%p2125_p8), [#allocation4], %s2194_s3 }
  0x33   : > { %s2200_s30 = scalar_lea.vmem (!%p2125_p8), [#allocation3], %s1677_s13 }
  0x34   : > { %1991 = dma.done.wait (%p2112_p4), %s289_s16, 4096  }
  0x35   : > { %1993 = vsyncadd (%p2112_p4), %s289_s16, 4294963200  ;;  %s298_s0 = sand.u32 1, %s2103_s24   ;;  %s1678_s2 = sshll.u32 %s2194_s3, 10 }
  0x36   : > { %s299_s20 = scalar_lea.sflag [#allocation7], %s298_s0  ;;  %s2208_s23 = scalar_lea.vmem [#allocation6], %s1678_s2 }
  0x37   : > { %1995 = dma.done.wait (%p2112_p4), %s299_s20, 16384  }
  0x38   : > { %1997 = vsyncadd (%p2112_p4), %s299_s20, 4294950912 }
  0x39   : > { %1999 = dma.done.wait (%p58_p1), [#allocation7], 8192  }
  0x3a   : > { %2001 = vsyncadd (%p58_p1), [#allocation7], 4294959104 }
  0x3b   : > { %2003 = dma.done.wait (%p58_p1), [#allocation10], 4096  }
  0x3c   : > { %2005 = vsyncadd (%p58_p1), [#allocation10], 4294963200  ;;  %v561_v0 = vld [vmem:[#allocation8 + $0x78] sm:$0xff]  ;;  %v560_v2 = vld [vmem:[#allocation8 + $0x70] sm:$0xff]  ;;  %s2412_s6 = scalar_lea.vmem [#allocation11], %s1677_s13  ;;  %s1690_s9 = sshll.u32 %s2024_s21, 8 }
  0x3d   : > { %v577_v1 = vld [vmem:[#allocation8 + $0xf8] sm:$0xff]  ;;  %1691 = vmatpush.msra.mxu2 %v561_v0  ;;  %v576_v3 = vld [vmem:[#allocation8 + $0xf0] sm:$0xff]  ;;  %v559_v4 = vld [vmem:[#allocation8 + $0x68] sm:$0xff]  ;;  %610 = vmatpush.msra.mxu0 %v561_v0  ;;  %s1531_s17 = scalar_lea.hbm %s2547_s5, %s1690_s9  ;;  %s1532_s10 = sshll.u32 %s2412_s6, 4  ;;  %s1533_s10 = int_to_ptr.vmem [resolvable:$true] %s1532_s10 }
  0x3e   : > { %1707 = vmatpush.msra.mxu3 %v577_v1  ;;  %v575_v5 = vld [vmem:[#allocation8 + $0xe8] sm:$0xff]  ;;  %723 = vmatpush.msra.mxu1 %v577_v1  ;;  %v558_v6 = vld [vmem:[#allocation8 + $0x60] sm:$0xff]  ;;  %v557_v8 = vld [vmem:[#allocation8 + $0x58] sm:$0xff]  ;;  %s1534_s7 = sshll.u32 %s1531_s17, 4  ;;  %s1520_s12 = scalar_lea.sflag [#allocation5], %s2194_s3  ;;  %s1535_s7 = int_to_ptr.hbm [resolvable:$true] %s1534_s7 }
  0x3f   : > { %1692 = vmatpush.msra.mxu2 %v560_v2  ;;  %v574_v7 = vld [vmem:[#allocation8 + $0xe0] sm:$0xff]  ;;  %611 = vmatpush.msra.mxu0 %v560_v2  ;;  %v573_v9 = vld [vmem:[#allocation8 + $0xd8] sm:$0xff]  ;;  %v556_v10 = vld [vmem:[#allocation8 + $0x50] sm:$0xff]  ;;  %s1952_s21 = sshra.s32 %s1535_s7, 4  ;;  %s1958_s14 = scalar_lea.hbm %s2547_s5, 512  ;;  %s1953_s21 = int_to_ptr.hbm [resolvable:$true] %s1952_s21 }
  0x40   : > { %1708 = vmatpush.msra.mxu3 %v576_v3  ;;  %724 = vmatpush.msra.mxu1 %v576_v3  ;;  %v572_v11 = vld [vmem:[#allocation8 + $0xd0] sm:$0xff]  ;;  %v555_v12 = vld [vmem:[#allocation8 + $0x48] sm:$0xff]  ;;  %v554_v14 = vld [vmem:[#allocation8 + $0x40] sm:$0xff]  ;;  %s1954_s8 = scalar_lea.hbm %s1953_s21, 256  ;;  %p1959_p10 = scmp.lt.s32.totalorder %s1953_s21, %s2547_s5 }
  0x41   : > { %1693 = vmatpush.msra.mxu2 %v559_v4  ;;  %612 = vmatpush.msra.mxu0 %v559_v4  ;;  %v571_v13 = vld [vmem:[#allocation8 + $0xc8] sm:$0xff]  ;;  %v570_v15 = vld [vmem:[#allocation8 + $0xc0] sm:$0xff]  ;;  %v553_v16 = vld [vmem:[#allocation8 + $0x38] sm:$0xff]  ;;  %p1955_p1 = scmp.ne.s32.totalorder %s1953_s21, %s1954_s8  ;;  %p1960_p12 = scmp.lt.s32.totalorder %s1958_s14, %s1954_s8 }
  0x42   : > { %1709 = vmatpush.msra.mxu3 %v575_v5  ;;  %725 = vmatpush.msra.mxu1 %v575_v5  ;;  %v569_v17 = vld [vmem:[#allocation8 + $0xb8] sm:$0xff]  ;;  %v552_v18 = vld [vmem:[#allocation8 + $0x30] sm:$0xff]  ;;  %v551_v20 = vld [vmem:[#allocation8 + $0x28] sm:$0xff] }
  0x43   : > { %1694 = vmatpush.msra.mxu2 %v558_v6  ;;  %613 = vmatpush.msra.mxu0 %v558_v6  ;;  %v568_v19 = vld [vmem:[#allocation8 + $0xb0] sm:$0xff]  ;;  %v567_v21 = vld [vmem:[#allocation8 + $0xa8] sm:$0xff]  ;;  %v550_v22 = vld [vmem:[#allocation8 + $0x20] sm:$0xff]  ;;  %p1956_p4 = pnand %p1955_p1, %p2157_p7  ;;  %p1961_p13 = por %p1960_p12, %p1959_p10 }
  0x44   : > { %1710 = vmatpush.msra.mxu3 %v574_v7  ;;  %726 = vmatpush.msra.mxu1 %v574_v7  ;;  %v566_v23 = vld [vmem:[#allocation8 + $0xa0] sm:$0xff]  ;;  %v549_v24 = vld [vmem:[#allocation8 + $0x18] sm:$0xff]  ;;  %v548_v26 = vld [vmem:[#allocation8 + $0x10] sm:$0xff] }
  0x45   : > { %1695 = vmatpush.msra.mxu2 %v557_v8  ;;  %614 = vmatpush.msra.mxu0 %v557_v8  ;;  %v565_v25 = vld [vmem:[#allocation8 + $0x98] sm:$0xff]  ;;  %v564_v27 = vld [vmem:[#allocation8 + $0x90] sm:$0xff]  ;;  %v547_v28 = vld [vmem:[#allocation8 + $0x8] sm:$0xff]  ;;  %p1957_p8 = pneg %p1956_p4 }
  0x46   : > { %1711 = vmatpush.msra.mxu3 %v573_v9  ;;  %727 = vmatpush.msra.mxu1 %v573_v9  ;;  %v563_v29 = vld [vmem:[#allocation8 + $0x88] sm:$0xff]  ;;  %v546_v30 = vld [vmem:[#allocation8] sm:$0xff]  ;;  %v593_v34 = vld [vmem:[#allocation8 + $0x178] sm:$0xff] }
  0x47   : > { %1696 = vmatpush.msra.mxu2 %v556_v10  ;;  %615 = vmatpush.msra.mxu0 %v556_v10  ;;  %v562_v31 = vld [vmem:[#allocation8 + $0x80] sm:$0xff]  ;;  %v483_v33 = vld [vmem:[%s2208_s23 + $0x208] sm:$0xff]  ;;  %v609_v35 = vld [vmem:[#allocation8 + $0x1f8] sm:$0xff]  ;;  %p1962_p0 = pnand %p1961_p13, %p1957_p8 }
  0x48   : > { %1712 = vmatpush.msra.mxu3 %v572_v11  ;;  %728 = vmatpush.msra.mxu1 %v572_v11  ;;  %v482_v32 = vld [vmem:[%s2208_s23 + $0x200] sm:$0xff]  ;;  %v592_v36 = vld [vmem:[#allocation8 + $0x170] sm:$0xff]  ;;  %v591_v38 = vld [vmem:[#allocation8 + $0x168] sm:$0xff] }
  0x49   : > { %1697 = vmatpush.msra.mxu2 %v555_v12  ;;  %616 = vmatpush.msra.mxu0 %v555_v12  ;;  %v608_v37 = vld [vmem:[#allocation8 + $0x1f0] sm:$0xff]  ;;  %v607_v39 = vld [vmem:[#allocation8 + $0x1e8] sm:$0xff]  ;;  %v590_v40 = vld [vmem:[#allocation8 + $0x160] sm:$0xff] }
  0x4a   : > { %1713 = vmatpush.msra.mxu3 %v571_v13  ;;  %729 = vmatpush.msra.mxu1 %v571_v13  ;;  %v606_v41 = vld [vmem:[#allocation8 + $0x1e0] sm:$0xff]  ;;  %v487_v43 = vld [vmem:[%s2208_s23 + $0x228] sm:$0xff]  ;;  %v589_v44 = vld [vmem:[#allocation8 + $0x158] sm:$0xff] }
  0x4b   : > { %1698 = vmatpush.msra.mxu2 %v554_v14  ;;  %617 = vmatpush.msra.mxu0 %v554_v14  ;;  %v486_v42 = vld [vmem:[%s2208_s23 + $0x220] sm:$0xff]  ;;  %v605_v45 = vld [vmem:[#allocation8 + $0x1d8] sm:$0xff]  ;;  %v588_v46 = vld [vmem:[#allocation8 + $0x150] sm:$0xff] }
  0x4c   : > { %1714 = vmatpush.msra.mxu3 %v570_v15  ;;  %730 = vmatpush.msra.mxu1 %v570_v15  ;;  %v604_v47 = vld [vmem:[#allocation8 + $0x1d0] sm:$0xff]  ;;  %v490_v48 = vld [vmem:[%s2208_s23 + $0x240] sm:$0xff]  ;;  %v491_v49 = vld [vmem:[%s2208_s23 + $0x248] sm:$0xff] }
  0x4d   : > { %1699 = vmatpush.msra.mxu2 %v553_v16  ;;  %618 = vmatpush.msra.mxu0 %v553_v16  ;;  %v587_v50 = vld [vmem:[#allocation8 + $0x148] sm:$0xff]  ;;  %v494_v52 = vld [vmem:[%s2208_s23 + $0x260] sm:$0xff]  ;;  %v585_v58 = vld [vmem:[#allocation8 + $0x138] sm:$0xff] }
  0x4e   : > { %1715 = vmatpush.msra.mxu3 %v569_v17  ;;  %731 = vmatpush.msra.mxu1 %v569_v17  ;;  %v603_v51 = vld [vmem:[#allocation8 + $0x1c8] sm:$0xff]  ;;  %v586_v54 = vld [vmem:[#allocation8 + $0x140] sm:$0xff]  ;;  %v601_v59 = vld [vmem:[#allocation8 + $0x1b8] sm:$0xff] }
  0x4f   : > { %1700 = vmatpush.msra.mxu2 %v552_v18  ;;  %619 = vmatpush.msra.mxu0 %v552_v18  ;;  %v495_v53 = vld [vmem:[%s2208_s23 + $0x268] sm:$0xff]  ;;  %v602_v55 = vld [vmem:[#allocation8 + $0x1c0] sm:$0xff]  ;;  %v584_v62 = vld [vmem:[#allocation8 + $0x130] sm:$0xff] }
  0x50   : > { %1716 = vmatpush.msra.mxu3 %v568_v19  ;;  %732 = vmatpush.msra.mxu1 %v568_v19  ;;  %v498_v56 = vld [vmem:[%s2208_s23 + $0x280] sm:$0xff]  ;;  %v499_v57 = vld [vmem:[%s2208_s23 + $0x288] sm:$0xff]  ;;  %v600_v63 = vld [vmem:[#allocation8 + $0x1b0] sm:$0xff] }
  0x51   : > { %1701 = vmatpush.msra.mxu2 %v551_v20  ;;  %620 = vmatpush.msra.mxu0 %v551_v20  ;;  %v502_v60 = vld [vmem:[%s2208_s23 + $0x2a0] sm:$0xff]  ;;  %v503_v61 = vld [vmem:[%s2208_s23 + $0x2a8] sm:$0xff]  ;;  %v581_v10 = vld [vmem:[#allocation8 + $0x118] sm:$0xff] }
  0x52   : > { %1717 = vmatpush.msra.mxu3 %v567_v21  ;;  %733 = vmatpush.msra.mxu1 %v567_v21  ;;  %v506_v0 = vld [vmem:[%s2208_s23 + $0x2c0] sm:$0xff]  ;;  %v507_v1 = vld [vmem:[%s2208_s23 + $0x2c8] sm:$0xff]  ;;  %v597_v11 = vld [vmem:[#allocation8 + $0x198] sm:$0xff] }
  0x53   : > { %1702 = vmatpush.msra.mxu2 %v550_v22  ;;  %621 = vmatpush.msra.mxu0 %v550_v22  ;;  %v583_v2 = vld [vmem:[#allocation8 + $0x128] sm:$0xff]  ;;  %v510_v4 = vld [vmem:[%s2208_s23 + $0x2e0] sm:$0xff]  ;;  %v580_v14 = vld [vmem:[#allocation8 + $0x110] sm:$0xff] }
  0x54   : > { %1718 = vmatpush.msra.mxu3 %v566_v23  ;;  %734 = vmatpush.msra.mxu1 %v566_v23  ;;  %v599_v3 = vld [vmem:[#allocation8 + $0x1a8] sm:$0xff]  ;;  %v582_v6 = vld [vmem:[#allocation8 + $0x120] sm:$0xff]  ;;  %v596_v15 = vld [vmem:[#allocation8 + $0x190] sm:$0xff] }
  0x55   : > { %1703 = vmatpush.msra.mxu2 %v549_v24  ;;  %622 = vmatpush.msra.mxu0 %v549_v24  ;;  %v511_v5 = vld [vmem:[%s2208_s23 + $0x2e8] sm:$0xff]  ;;  %v598_v7 = vld [vmem:[#allocation8 + $0x1a0] sm:$0xff] }
  0x56   : > { %1719 = vmatpush.msra.mxu3 %v565_v25  ;;  %735 = vmatpush.msra.mxu1 %v565_v25  ;;  %v514_v8 = vld [vmem:[%s2208_s23 + $0x300] sm:$0xff]  ;;  %v515_v9 = vld [vmem:[%s2208_s23 + $0x308] sm:$0xff] }
  0x57   : > { %1704 = vmatpush.msra.mxu2 %v548_v26  ;;  %623 = vmatpush.msra.mxu0 %v548_v26  ;;  %v518_v12 = vld [vmem:[%s2208_s23 + $0x320] sm:$0xff]  ;;  %v519_v13 = vld [vmem:[%s2208_s23 + $0x328] sm:$0xff] }
  0x58   : > { %1720 = vmatpush.msra.mxu3 %v564_v27  ;;  %736 = vmatpush.msra.mxu1 %v564_v27  ;;  %v522_v16 = vld [vmem:[%s2208_s23 + $0x340] sm:$0xff]  ;;  %v523_v17 = vld [vmem:[%s2208_s23 + $0x348] sm:$0xff] }
  0x59   : > { %1705 = vmatpush.msra.mxu2 %v547_v28  ;;  %624 = vmatpush.msra.mxu0 %v547_v28  ;;  %v579_v18 = vld [vmem:[#allocation8 + $0x108] sm:$0xff]  ;;  %v526_v20 = vld [vmem:[%s2208_s23 + $0x360] sm:$0xff] }
  0x5a   : > { %1721 = vmatpush.msra.mxu3 %v563_v29  ;;  %737 = vmatpush.msra.mxu1 %v563_v29  ;;  %v595_v19 = vld [vmem:[#allocation8 + $0x188] sm:$0xff]  ;;  %v578_v22 = vld [vmem:[#allocation8 + $0x100] sm:$0xff] }
  0x5b   : > { %1706 = vmatpush.msra.mxu2 %v546_v30  ;;  %625 = vmatpush.msra.mxu0 %v546_v30  ;;  %v527_v21 = vld [vmem:[%s2208_s23 + $0x368] sm:$0xff]  ;;  %v594_v23 = vld [vmem:[#allocation8 + $0x180] sm:$0xff]  ;;  %v1208_v30 = vld [vmem:[#allocation9 + $0x78] sm:$0xff] }
  0x5c   : > { %1722 = vmatpush.msra.mxu3 %v562_v31  ;;  %674 = vmatmul.f32.vlgmr.msra.gmra.mxu2 %v482_v32  ;;  %v530_v24 = vld [vmem:[%s2208_s23 + $0x380] sm:$0xff]  ;;  %v531_v25 = vld [vmem:[%s2208_s23 + $0x388] sm:$0xff] }
  0x5d   : > { %787 = vmatmul.f32.vlgmr.msra.gmra.mxu3 %v483_v33  ;;  %836 = vmatpush.msrb.mxu2 %v593_v34  ;;  %v418_v26 = vld [vmem:[%s2208_s23] sm:$0xff]  ;;  %v419_v27 = vld [vmem:[%s2208_s23 + $0x8] sm:$0xff] }
  0x5e   : > { %949 = vmatpush.msrb.mxu3 %v609_v35  ;;  %738 = vmatpush.msra.mxu1 %v562_v31  ;;  %v534_v28 = vld [vmem:[%s2208_s23 + $0x3a0] sm:$0xff]  ;;  %v535_v29 = vld [vmem:[%s2208_s23 + $0x3a8] sm:$0xff]  ;;  %v1224_v31 = vld [vmem:[#allocation9 + $0xf8] sm:$0xff] }
  0x5f   : > { %837 = vmatpush.msrb.mxu2 %v592_v36  ;;  %626 = vmatmul.f32.vlgmr.msra.gmra.mxu0 %v418_v26  ;;  %v422_v32 = vld [vmem:[%s2208_s23 + $0x20] sm:$0xff]  ;;  %v423_v33 = vld [vmem:[%s2208_s23 + $0x28] sm:$0xff]  ;;  %v1207_v36 = vld [vmem:[#allocation9 + $0x70] sm:$0xff] }
  0x60   : > { %950 = vmatpush.msrb.mxu3 %v608_v37  ;;  %739 = vmatmul.f32.vlgmr.msra.gmra.mxu1 %v419_v27  ;;  %v538_v34 = vld [vmem:[%s2208_s23 + $0x3c0] sm:$0xff]  ;;  %v539_v35 = vld [vmem:[%s2208_s23 + $0x3c8] sm:$0xff]  ;;  %v1223_v37 = vld [vmem:[#allocation9 + $0xf0] sm:$0xff] }
  0x61   : > { %838 = vmatpush.msrb.mxu2 %v591_v38  ;;  %1229 = vmatpush.msrb.mxu0 %v1208_v30  ;;  %v426_v38 = vld [vmem:[%s2208_s23 + $0x40] sm:$0xff]  ;;  %v440_v27 = vld [vmem:[%s2208_s23 + $0xb0] sm:$0xff]  ;;  %v1216_v30 = vld [vmem:[#allocation9 + $0xb8] sm:$0xff] }
  0x62   : > { %951 = vmatpush.msrb.mxu3 %v607_v39  ;;  %1342 = vmatpush.msrb.mxu1 %v1224_v31  ;;  %v427_v39 = vld [vmem:[%s2208_s23 + $0x48] sm:$0xff] }
  0x63   : > { %839 = vmatpush.msrb.mxu2 %v590_v40  ;;  %1230 = vmatpush.msrb.mxu0 %v1207_v36  ;;  %v542_v40 = vld [vmem:[%s2208_s23 + $0x3e0] sm:$0xff]  ;;  %v444_v36 = vld [vmem:[%s2208_s23 + $0xd0] sm:$0xff] }
  0x64   : > { %952 = vmatpush.msrb.mxu3 %v606_v41  ;;  %677 = vmatmul.f32.gmra.mxu2 %v486_v42  ;;  %v543_v41 = vld [vmem:[%s2208_s23 + $0x3e8] sm:$0xff] }
  0x65   : > { %790 = vmatmul.f32.gmra.mxu3 %v487_v43  ;;  %840 = vmatpush.msrb.mxu2 %v589_v44  ;;  %v1206_v42 = vld [vmem:[#allocation9 + $0x68] sm:$0xff]  ;;  %v430_v44 = vld [vmem:[%s2208_s23 + $0x60] sm:$0xff] }
  0x66   : > { %953 = vmatpush.msrb.mxu3 %v605_v45  ;;  %1343 = vmatpush.msrb.mxu1 %v1223_v37  ;;  %v1222_v43 = vld [vmem:[#allocation9 + $0xe8] sm:$0xff]  ;;  %v445_v37 = vld [vmem:[%s2208_s23 + $0xd8] sm:$0xff] }
  0x67   : > { %841 = vmatpush.msrb.mxu2 %v588_v46  ;;  %629 = vmatmul.f32.gmra.mxu0 %v422_v32  ;;  %v431_v45 = vld [vmem:[%s2208_s23 + $0x68] sm:$0xff]  ;;  %v420_v46 = vld [vmem:[%s2208_s23 + $0x10] sm:$0xff] }
  0x68   : > { %954 = vmatpush.msrb.mxu3 %v604_v47  ;;  %742 = vmatmul.f32.gmra.mxu1 %v423_v33  ;;  %v421_v47 = vld [vmem:[%s2208_s23 + $0x18] sm:$0xff]  ;;  %v454_v33 = vld [vmem:[%s2208_s23 + $0x120] sm:$0xff] }
  0x69   : > { %842 = vmatpush.msrb.mxu2 %v587_v50  ;;  %1231 = vmatpush.msrb.mxu0 %v1206_v42  ;;  %v458_v42 = vld [vmem:[%s2208_s23 + $0x140] sm:$0xff] }
  0x6a   : > { %955 = vmatpush.msrb.mxu3 %v603_v51  ;;  %1344 = vmatpush.msrb.mxu1 %v1222_v43  ;;  %v459_v43 = vld [vmem:[%s2208_s23 + $0x148] sm:$0xff] }
  0x6b   : > { %843 = vmatpush.msrb.mxu2 %v586_v54 }
  0x6c   : > { %680 = vmatmul.f32.gmra.mxu2 %v490_v48  ;;  %956 = vmatpush.msrb.mxu3 %v602_v55  ;;  %v1205_v48 = vld [vmem:[#allocation9 + $0x60] sm:$0xff]  ;;  %v424_v55 = vld [vmem:[%s2208_s23 + $0x30] sm:$0xff] }
  0x6d   : > { %793 = vmatmul.f32.gmra.mxu3 %v491_v49  ;;  %844 = vmatpush.msrb.mxu2 %v585_v58  ;;  %v1221_v49 = vld [vmem:[#allocation9 + $0xe0] sm:$0xff]  ;;  %v1220_v58 = vld [vmem:[#allocation9 + $0xd8] sm:$0xff] }
  0x6e   : > { %957 = vmatpush.msrb.mxu3 %v601_v59  ;;  %1232 = vmatpush.msrb.mxu0 %v1205_v48  ;;  %v1214_v48 = vld [vmem:[#allocation9 + $0xa8] sm:$0xff] }
  0x6f   : > { %845 = vmatpush.msrb.mxu2 %v584_v62  ;;  %632 = vmatmul.f32.gmra.mxu0 %v426_v38  ;;  %v439_v62 = vld [vmem:[%s2208_s23 + $0xa8] sm:$0xff]  ;;  %v1199_v38 = vld [vmem:[#allocation9 + $0x30] sm:$0xff] }
  0x70   : > { %958 = vmatpush.msrb.mxu3 %v600_v63  ;;  %745 = vmatmul.f32.gmra.mxu1 %v427_v39  ;;  %v1215_v39 = vld [vmem:[#allocation9 + $0xb0] sm:$0xff] }
  0x71   : > { %846 = vmatpush.msrb.mxu2 %v583_v2  ;;  %1345 = vmatpush.msrb.mxu1 %v1221_v49  ;;  %v1203_v2 = vld [vmem:[#allocation9 + $0x50] sm:$0xff] }
  0x72   : > { %959 = vmatpush.msrb.mxu3 %v599_v3  ;;  %v1219_v3 = vld [vmem:[#allocation9 + $0xd0] sm:$0xff] }
  0x73   : > { %847 = vmatpush.msrb.mxu2 %v582_v6  ;;  %1346 = vmatpush.msrb.mxu1 %v1220_v58  ;;  %v442_v6 = vld [vmem:[%s2208_s23 + $0xc0] sm:$0xff] }
  0x74   : > { %683 = vmatmul.f32.gmra.mxu2 %v494_v52  ;;  %960 = vmatpush.msrb.mxu3 %v598_v7  ;;  %v434_v52 = vld [vmem:[%s2208_s23 + $0x80] sm:$0xff]  ;;  %v443_v7 = vld [vmem:[%s2208_s23 + $0xc8] sm:$0xff] }
  0x75   : > { %796 = vmatmul.f32.gmra.mxu3 %v495_v53  ;;  %848 = vmatpush.msrb.mxu2 %v581_v10  ;;  %v435_v53 = vld [vmem:[%s2208_s23 + $0x88] sm:$0xff]  ;;  %v433_v10 = vld [vmem:[%s2208_s23 + $0x78] sm:$0xff]  ;;  %v1213_v58 = vld [vmem:[#allocation9 + $0xa0] sm:$0xff] }
  0x76   : > { %961 = vmatpush.msrb.mxu3 %v597_v11  ;;  %1347 = vmatpush.msrb.mxu1 %v1219_v3  ;;  %v1202_v11 = vld [vmem:[#allocation9 + $0x48] sm:$0xff]  ;;  %v1196_v3 = vld [vmem:[#allocation9 + $0x18] sm:$0xff] }
  0x77   : > { %849 = vmatpush.msrb.mxu2 %v580_v14  ;;  %635 = vmatmul.f32.gmra.mxu0 %v430_v44 }
  0x78   : > { %962 = vmatpush.msrb.mxu3 %v596_v15  ;;  %748 = vmatmul.f32.gmra.mxu1 %v431_v45  ;;  %v446_v15 = vld [vmem:[%s2208_s23 + $0xe0] sm:$0xff]  ;;  %v448_v45 = vld [vmem:[%s2208_s23 + $0xf0] sm:$0xff] }
  0x79   : > { %850 = vmatpush.msrb.mxu2 %v579_v18  ;;  %v436_v18 = vld [vmem:[%s2208_s23 + $0x90] sm:$0xff] }
  0x7a   : > { %963 = vmatpush.msrb.mxu3 %v595_v19  ;;  %v437_v19 = vld [vmem:[%s2208_s23 + $0x98] sm:$0xff] }
  0x7b   : > { %851 = vmatpush.msrb.mxu2 %v578_v22 }
  0x7c   : > { %686 = vmatmul.f32.gmra.mxu2 %v498_v56  ;;  %964 = vmatpush.msrb.mxu3 %v594_v23  ;;  %v425_v56 = vld [vmem:[%s2208_s23 + $0x38] sm:$0xff] }
  0x7d   : > { %799 = vmatmul.f32.gmra.mxu3 %v499_v57  ;;  %v1204_v57 = vld [vmem:[#allocation9 + $0x58] sm:$0xff] }
  0x7e   : > { %1233 = vmatpush.msrb.mxu0 %v1204_v57  ;;  %v1197_v57 = vld [vmem:[#allocation9 + $0x20] sm:$0xff] }
  0x7f   : > { %638 = vmatmul.f32.gmra.mxu0 %v434_v52  ;;  %v463_v52 = vld [vmem:[%s2208_s23 + $0x168] sm:$0xff] }
  0x80   : > { %751 = vmatmul.f32.gmra.mxu1 %v435_v53  ;;  %1234 = vmatpush.msrb.mxu0 %v1203_v2  ;;  %v457_v2 = vld [vmem:[%s2208_s23 + $0x138] sm:$0xff] }
  0x82   : > { %1235 = vmatpush.msrb.mxu0 %v1202_v11  ;;  %v460_v11 = vld [vmem:[%s2208_s23 + $0x150] sm:$0xff] }
  0x84   : > { %689 = vmatmul.f32.gmra.mxu2 %v502_v60 }
  0x85   : > { %802 = vmatmul.f32.gmra.mxu3 %v503_v61  ;;  %v438_v61 = vld [vmem:[%s2208_s23 + $0xa0] sm:$0xff] }
  0x87   : > { %641 = vmatmul.f32.gmra.mxu0 %v438_v61  ;;  %v466_v61 = vld [vmem:[%s2208_s23 + $0x180] sm:$0xff] }
  0x88   : > { %754 = vmatmul.f32.gmra.mxu1 %v439_v62  ;;  %v467_v62 = vld [vmem:[%s2208_s23 + $0x188] sm:$0xff] }
  0x8c   : > { %692 = vmatmul.f32.gmra.mxu2 %v506_v0  ;;  %v428_v0 = vld [vmem:[%s2208_s23 + $0x50] sm:$0xff] }
  0x8d   : > { %805 = vmatmul.f32.gmra.mxu3 %v507_v1  ;;  %v429_v1 = vld [vmem:[%s2208_s23 + $0x58] sm:$0xff] }
  0x8f   : > { %644 = vmatmul.f32.gmra.mxu0 %v442_v6 }
  0x90   : > { %757 = vmatmul.f32.gmra.mxu1 %v443_v7  ;;  %v470_v7 = vld [vmem:[%s2208_s23 + $0x1a0] sm:$0xff] }
  0x94   : > { %695 = vmatmul.f32.gmra.mxu2 %v510_v4 }
  0x95   : > { %808 = vmatmul.f32.gmra.mxu3 %v511_v5 }
  0x97   : > { %647 = vmatmul.f32.gmra.mxu0 %v446_v15 }
  0x9c   : > { %698 = vmatmul.f32.gmra.mxu2 %v514_v8 }
  0x9d   : > { %811 = vmatmul.f32.gmra.mxu3 %v515_v9  ;;  %v432_v9 = vld [vmem:[%s2208_s23 + $0x70] sm:$0xff] }
  0xa4   : > { %701 = vmatmul.f32.gmra.mxu2 %v518_v12  ;;  %v1218_v12 = vld [vmem:[#allocation9 + $0xc8] sm:$0xff] }
  0xa5   : > { %814 = vmatmul.f32.gmra.mxu3 %v519_v13  ;;  %1348 = vmatpush.msrb.mxu1 %v1218_v12  ;;  %v461_v12 = vld [vmem:[%s2208_s23 + $0x158] sm:$0xff] }
  0xac   : > { %704 = vmatmul.f32.gmra.mxu2 %v522_v16  ;;  %v447_v16 = vld [vmem:[%s2208_s23 + $0xe8] sm:$0xff] }
  0xad   : > { %817 = vmatmul.f32.gmra.mxu3 %v523_v17  ;;  %760 = vmatmul.f32.gmra.mxu1 %v447_v16 }
  0xb4   : > { %707 = vmatmul.f32.gmra.mxu2 %v526_v20  ;;  %v1201_v20 = vld [vmem:[#allocation9 + $0x40] sm:$0xff] }
  0xb5   : > { %820 = vmatmul.f32.gmra.mxu3 %v527_v21  ;;  %v1217_v21 = vld [vmem:[#allocation9 + $0xc0] sm:$0xff]  ;;  %1236 = vmatpush.msrb.mxu0 %v1201_v20 }
  0xb6   : > { %1349 = vmatpush.msrb.mxu1 %v1217_v21  ;;  %v464_v21 = vld [vmem:[%s2208_s23 + $0x170] sm:$0xff] }
  0xb8   : > { %1350 = vmatpush.msrb.mxu1 %v1216_v30 }
  0xba   : > { %1351 = vmatpush.msrb.mxu1 %v1215_v39 }
  0xbc   : > { %710 = vmatmul.f32.gmra.mxu2 %v530_v24  ;;  %v450_v24 = vld [vmem:[%s2208_s23 + $0x100] sm:$0xff]  ;;  %1352 = vmatpush.msrb.mxu1 %v1214_v48 }
  0xbd   : > { %823 = vmatmul.f32.gmra.mxu3 %v531_v25  ;;  %v451_v25 = vld [vmem:[%s2208_s23 + $0x108] sm:$0xff]  ;;  %650 = vmatmul.f32.gmra.mxu0 %v450_v24 }
  0xbe   : > { %763 = vmatmul.f32.gmra.mxu1 %v451_v25  ;;  %v1210_v24 = vld [vmem:[#allocation9 + $0x88] sm:$0xff] }
  0xbf   : > { %1353 = vmatpush.msrb.mxu1 %v1213_v58 }
  0xc4   : > { %713 = vmatmul.f32.gmra.mxu2 %v534_v28  ;;  %v441_v28 = vld [vmem:[%s2208_s23 + $0xb8] sm:$0xff] }
  0xc5   : > { %826 = vmatmul.f32.gmra.mxu3 %v535_v29  ;;  %v1200_v29 = vld [vmem:[#allocation9 + $0x38] sm:$0xff]  ;;  %653 = vmatmul.f32.gmra.mxu0 %v454_v33  ;;  %v1193_v33 = vld [vmem:[#allocation9] sm:$0xff] }
  0xc6   : > { %1237 = vmatpush.msrb.mxu0 %v1200_v29  ;;  %v479_v29 = vld [vmem:[%s2208_s23 + $0x1e8] sm:$0xff] }
  0xc8   : > { %1238 = vmatpush.msrb.mxu0 %v1199_v38 }
  0xcc   : > { %716 = vmatmul.f32.gmra.mxu2 %v538_v34  ;;  %v455_v34 = vld [vmem:[%s2208_s23 + $0x128] sm:$0xff] }
  0xcd   : > { %829 = vmatmul.f32.gmra.mxu3 %v539_v35  ;;  %766 = vmatmul.f32.gmra.mxu1 %v455_v34  ;;  %v1209_v34 = vld [vmem:[#allocation9 + $0x80] sm:$0xff] }
  0xce   : > { %656 = vmatmul.f32.gmra.mxu0 %v458_v42  ;;  %v473_v42 = vld [vmem:[%s2208_s23 + $0x1b8] sm:$0xff] }
  0xd4   : > { %719 = vmatmul.f32.gmra.mxu2 %v542_v40 }
  0xd5   : > { %832 = vmatmul.f32.gmra.mxu3 %v543_v41  ;;  %769 = vmatmul.f32.gmra.mxu1 %v459_v43 }
  0xdc   : > { %852 = vmatmul.f32.vlgmr.msrb.gmra.mxu2 %v420_v46  ;;  %v449_v46 = vld [vmem:[%s2208_s23 + $0xf8] sm:$0xff] }
  0xdd   : > { %965 = vmatmul.f32.vlgmr.msrb.gmra.mxu3 %v421_v47  ;;  %v1198_v47 = vld [vmem:[#allocation9 + $0x28] sm:$0xff]  ;;  %772 = vmatmul.f32.gmra.mxu1 %v463_v52 }
  0xde   : > { %1239 = vmatpush.msrb.mxu0 %v1198_v47 }
  0xdf   : > { %v675_v50 = vpop.f32.mrf.mxu2 }
  0xe0   : > { %v788_v51 = vpop.f32.mrf.mxu3  ;;  %1240 = vmatpush.msrb.mxu0 %v1197_v57 }
  0xe1   : > { %v2266_v54 = vadd.f32 %v788_v51, %v675_v50  ;;  %v462_v51 = vld [vmem:[%s2208_s23 + $0x160] sm:$0xff] }
  0xe2   : > { %659 = vmatmul.f32.gmra.mxu0 %v462_v51  ;;  %v477_v51 = vld [vmem:[%s2208_s23 + $0x1d8] sm:$0xff] }
  0xe3   : > { %1241 = vmatpush.msrb.mxu0 %v1196_v3 }
  0xe4   : > { %855 = vmatmul.f32.gmra.mxu2 %v424_v55  ;;  %v452_v55 = vld [vmem:[%s2208_s23 + $0x110] sm:$0xff] }
  0xe5   : > { %968 = vmatmul.f32.gmra.mxu3 %v425_v56  ;;  %v453_v56 = vld [vmem:[%s2208_s23 + $0x118] sm:$0xff]  ;;  %775 = vmatmul.f32.gmra.mxu1 %v467_v62 }
  0xe7   : > { %v678_v59 = vpop.f32.mrf.mxu2 }
  0xe8   : > { %v791_v60 = vpop.f32.mrf.mxu3 }
  0xe9   : > { %v2272_v63 = vadd.f32 %v791_v60, %v678_v59 }
  0xea   : > { %662 = vmatmul.f32.gmra.mxu0 %v466_v61  ;;  %v481_v61 = vld [vmem:[%s2208_s23 + $0x1f8] sm:$0xff] }
  0xec   : > { %858 = vmatmul.f32.gmra.mxu2 %v428_v0 }
  0xed   : > { %971 = vmatmul.f32.gmra.mxu3 %v429_v1  ;;  %v456_v1 = vld [vmem:[%s2208_s23 + $0x130] sm:$0xff] }
  0xef   : > { %v681_v4 = vpop.f32.mrf.mxu2 }
  0xf0   : > { %v794_v5 = vpop.f32.mrf.mxu3 }
  0xf1   : > { %v2278_v8 = vadd.f32 %v794_v5, %v681_v4  ;;  %v1212_v4 = vld [vmem:[#allocation9 + $0x98] sm:$0xff] }
  0xf2   : > { %1354 = vmatpush.msrb.mxu1 %v1212_v4  ;;  %665 = vmatmul.f32.gmra.mxu0 %v470_v7  ;;  %v485_v7 = vld [vmem:[%s2208_s23 + $0x218] sm:$0xff] }
  0xf4   : > { %861 = vmatmul.f32.gmra.mxu2 %v432_v9  ;;  %v471_v9 = vld [vmem:[%s2208_s23 + $0x1a8] sm:$0xff] }
  0xf5   : > { %974 = vmatmul.f32.gmra.mxu3 %v433_v10  ;;  %778 = vmatmul.f32.gmra.mxu1 %v471_v9 }
  0xf7   : > { %v684_v13 = vpop.f32.mrf.mxu2 }
  0xf8   : > { %v797_v14 = vpop.f32.mrf.mxu3 }
  0xf9   : > { %v2284_v17 = vadd.f32 %v797_v14, %v684_v13  ;;  %v1195_v13 = vld [vmem:[#allocation9 + $0x10] sm:$0xff] }
  0xfa   : > { %v1211_v14 = vld [vmem:[#allocation9 + $0x90] sm:$0xff]  ;;  %1242 = vmatpush.msrb.mxu0 %v1195_v13 }
  0xfb   : > { %1355 = vmatpush.msrb.mxu1 %v1211_v14 }
  0xfc   : > { %864 = vmatmul.f32.gmra.mxu2 %v436_v18  ;;  %v474_v18 = vld [vmem:[%s2208_s23 + $0x1c0] sm:$0xff] }
  0xfd   : > { %977 = vmatmul.f32.gmra.mxu3 %v437_v19  ;;  %v475_v19 = vld [vmem:[%s2208_s23 + $0x1c8] sm:$0xff]  ;;  %668 = vmatmul.f32.gmra.mxu0 %v474_v18 }
  0xfe   : > { %781 = vmatmul.f32.gmra.mxu1 %v475_v19  ;;  %v489_v19 = vld [vmem:[%s2208_s23 + $0x238] sm:$0xff] }
  0xff   : > { %v687_v22 = vpop.f32.mrf.mxu2  ;;  %1356 = vmatpush.msrb.mxu1 %v1210_v24  ;;  %v1165_v24 = vld [vmem:[%s2200_s30 + $0x20] sm:$0xff] }
 0x100   : > { %v800_v23 = vpop.f32.mrf.mxu3 }
 0x101   : > { %v2290_v26 = vadd.f32 %v800_v23, %v687_v22  ;;  %v465_v22 = vld [vmem:[%s2208_s23 + $0x178] sm:$0xff]  ;;  %v1194_v23 = vld [vmem:[#allocation9 + $0x8] sm:$0xff]  ;;  %1357 = vmatpush.msrb.mxu1 %v1209_v34 }
 0x102   : > { %1243 = vmatpush.msrb.mxu0 %v1194_v23 }
 0x104   : > { %867 = vmatmul.f32.gmra.mxu2 %v440_v27  ;;  %1244 = vmatpush.msrb.mxu0 %v1193_v33 }
 0x105   : > { %980 = vmatmul.f32.gmra.mxu3 %v441_v28  ;;  %v478_v28 = vld [vmem:[%s2208_s23 + $0x1e0] sm:$0xff] }
 0x106   : > { %671 = vmatmul.f32.gmra.mxu0 %v478_v28  ;;  %784 = vmatmul.f32.gmra.mxu1 %v479_v29  ;;  %v492_v29 = vld [vmem:[%s2208_s23 + $0x250] sm:$0xff] }
 0x107   : > { %v690_v31 = vpop.f32.mrf.mxu2 }
 0x108   : > { %v803_v32 = vpop.f32.mrf.mxu3 }
 0x109   : > { %v2296_v35 = vadd.f32 %v803_v32, %v690_v31  ;;  %v468_v31 = vld [vmem:[%s2208_s23 + $0x190] sm:$0xff]  ;;  %v469_v32 = vld [vmem:[%s2208_s23 + $0x198] sm:$0xff] }
 0x10c   : > { %870 = vmatmul.f32.gmra.mxu2 %v444_v36  ;;  %v627_v36 = vpop.f32.mrf.mxu0 }
 0x10d   : > { %983 = vmatmul.f32.gmra.mxu3 %v445_v37  ;;  %v740_v37 = vpop.f32.mrf.mxu1 }
 0x10e   : > { %v741_v9 = vadd.f32 %v740_v37, %v627_v36  ;;  %v1166_v37 = vld [vmem:[%s2200_s30 + $0x28] sm:$0xff] }
 0x10f   : > { %v693_v40 = vpop.f32.mrf.mxu2 }
 0x110   : > { %v806_v41 = vpop.f32.mrf.mxu3 }
 0x111   : > { %v2302_v44 = vadd.f32 %v806_v41, %v693_v40  ;;  %v472_v41 = vld [vmem:[%s2208_s23 + $0x1b0] sm:$0xff] }
 0x114   : > { %873 = vmatmul.f32.gmra.mxu2 %v448_v45  ;;  %v630_v43 = vpop.f32.mrf.mxu0 }
 0x115   : > { %986 = vmatmul.f32.gmra.mxu3 %v449_v46  ;;  %v743_v45 = vpop.f32.mrf.mxu1  ;;  %v1161_v46 = vld [vmem:[%s2200_s30] sm:$0xff] }
 0x116   : > { %1358 = vmatmul.f32.vlgmr.msrb.gmra.mxu1 %v1161_v46 }
 0x117   : > { %v696_v49 = vpop.f32.mrf.mxu2 }
 0x118   : > { %v809_v50 = vpop.f32.mrf.mxu3 }
 0x119   : > { %v2308_v53 = vadd.f32 %v809_v50, %v696_v49  ;;  %v476_v50 = vld [vmem:[%s2208_s23 + $0x1d0] sm:$0xff] }
 0x11c   : > { %876 = vmatmul.f32.gmra.mxu2 %v452_v55  ;;  %v1162_v55 = vld [vmem:[%s2200_s30 + $0x8] sm:$0xff] }
 0x11d   : > { %989 = vmatmul.f32.gmra.mxu3 %v453_v56  ;;  %v746_v52 = vpop.f32.mrf.mxu1  ;;  %v633_v56 = vpop.f32.mrf.mxu0 }
 0x11e   : > { %1361 = vmatmul.f32.gmra.mxu1 %v1162_v55  ;;  %v747_v33 = vadd.f32 %v746_v52, %v633_v56  ;;  %v500_v56 = vld [vmem:[%s2208_s23 + $0x290] sm:$0xff] }
 0x11f   : > { %v699_v59 = vpop.f32.mrf.mxu2 }
 0x120   : > { %v812_v60 = vpop.f32.mrf.mxu3 }
 0x121   : > { %v2314_v0 = vadd.f32 %v812_v60, %v699_v59  ;;  %v480_v60 = vld [vmem:[%s2208_s23 + $0x1f0] sm:$0xff] }
 0x124   : > { %879 = vmatmul.f32.gmra.mxu2 %v456_v1  ;;  %v1163_v1 = vld [vmem:[%s2200_s30 + $0x10] sm:$0xff] }
 0x125   : > { %992 = vmatmul.f32.gmra.mxu3 %v457_v2  ;;  %v749_v62 = vpop.f32.mrf.mxu1 }
 0x126   : > { %1364 = vmatmul.f32.gmra.mxu1 %v1163_v1 }
 0x127   : > { %v702_v5 = vpop.f32.mrf.mxu2 }
 0x128   : > { %v815_v6 = vpop.f32.mrf.mxu3 }
 0x129   : > { %v2320_v10 = vadd.f32 %v815_v6, %v702_v5  ;;  %v636_v5 = vpop.f32.mrf.mxu0  ;;  %v484_v6 = vld [vmem:[%s2208_s23 + $0x210] sm:$0xff] }
 0x12a   : > { %v750_v46 = vadd.f32 %v749_v62, %v636_v5  ;;  %v1168_v62 = vld [vmem:[%s2200_s30 + $0x38] sm:$0xff] }
 0x12c   : > { %882 = vmatmul.f32.gmra.mxu2 %v460_v11 }
 0x12d   : > { %995 = vmatmul.f32.gmra.mxu3 %v461_v12  ;;  %v752_v11 = vpop.f32.mrf.mxu1  ;;  %v1164_v12 = vld [vmem:[%s2200_s30 + $0x18] sm:$0xff] }
 0x12e   : > { %1367 = vmatmul.f32.gmra.mxu1 %v1164_v12 }
 0x12f   : > { %v705_v15 = vpop.f32.mrf.mxu2 }
 0x130   : > { %v818_v16 = vpop.f32.mrf.mxu3 }
 0x131   : > { %v2326_v20 = vadd.f32 %v818_v16, %v705_v15  ;;  %v488_v16 = vld [vmem:[%s2208_s23 + $0x230] sm:$0xff] }
 0x134   : > { %885 = vmatmul.f32.gmra.mxu2 %v464_v21  ;;  %v639_v21 = vpop.f32.mrf.mxu0 }
 0x135   : > { %998 = vmatmul.f32.gmra.mxu3 %v465_v22  ;;  %v744_v22 = vadd.f32 %v743_v45, %v630_v43  ;;  %v755_v23 = vpop.f32.mrf.mxu1  ;;  %v497_v45 = vld [vmem:[%s2208_s23 + $0x278] sm:$0xff] }
 0x136   : > { %1370 = vmatmul.f32.gmra.mxu1 %v1165_v24 }
 0x137   : > { %v708_v25 = vpop.f32.mrf.mxu2 }
 0x138   : > { %v821_v27 = vpop.f32.mrf.mxu3 }
 0x139   : > { %v2332_v30 = vadd.f32 %v821_v27, %v708_v25 }
 0x13c   : > { %888 = vmatmul.f32.gmra.mxu2 %v468_v31  ;;  %v642_v34 = vpop.f32.mrf.mxu0 }
 0x13d   : > { %1001 = vmatmul.f32.gmra.mxu3 %v469_v32  ;;  %v493_v32 = vld [vmem:[%s2208_s23 + $0x258] sm:$0xff]  ;;  %v758_v36 = vpop.f32.mrf.mxu1  ;;  %v756_v12 = vadd.f32 %v755_v23, %v642_v34 }
 0x13e   : > { %1373 = vmatmul.f32.gmra.mxu1 %v1166_v37 }
 0x13f   : > { %v711_v38 = vpop.f32.mrf.mxu2 }
 0x140   : > { %v824_v39 = vpop.f32.mrf.mxu3 }
 0x141   : > { %v2336_v40 = vadd.f32 %v824_v39, %v711_v38 }
 0x144   : > { %891 = vmatmul.f32.gmra.mxu2 %v472_v41 }
 0x145   : > { %1004 = vmatmul.f32.gmra.mxu3 %v473_v42  ;;  %v496_v42 = vld [vmem:[%s2208_s23 + $0x270] sm:$0xff] }
 0x147   : > { %v714_v47 = vpop.f32.mrf.mxu2 }
 0x148   : > { %v827_v48 = vpop.f32.mrf.mxu3 }
 0x149   : > { %v2341_v49 = vadd.f32 %v827_v48, %v714_v47  ;;  %v761_v47 = vpop.f32.mrf.mxu1  ;;  %v1167_v48 = vld [vmem:[%s2200_s30 + $0x30] sm:$0xff] }
 0x14a   : > { %1376 = vmatmul.f32.gmra.mxu1 %v1167_v48 }
 0x14c   : > { %894 = vmatmul.f32.gmra.mxu2 %v476_v50  ;;  %v645_v50 = vpop.f32.mrf.mxu0 }
 0x14d   : > { %1007 = vmatmul.f32.gmra.mxu3 %v477_v51  ;;  %v759_v24 = vadd.f32 %v758_v36, %v645_v50  ;;  %v1172_v50 = vld [vmem:[%s2200_s30 + $0x58] sm:$0xff] }
 0x14f   : > { %v717_v57 = vpop.f32.mrf.mxu2 }
 0x150   : > { %v830_v58 = vpop.f32.mrf.mxu3 }
 0x151   : > { %v2346_v59 = vadd.f32 %v830_v58, %v717_v57  ;;  %v501_v58 = vld [vmem:[%s2208_s23 + $0x298] sm:$0xff] }
 0x152   : > { %1379 = vmatmul.f32.gmra.mxu1 %v1168_v62 }
 0x154   : > { %897 = vmatmul.f32.gmra.mxu2 %v480_v60  ;;  %v753_v60 = vadd.f32 %v752_v11, %v639_v21  ;;  %v648_v5 = vpop.f32.mrf.mxu0  ;;  %v509_v21 = vld [vmem:[%s2208_s23 + $0x2d8] sm:$0xff] }
 0x155   : > { %1010 = vmatmul.f32.gmra.mxu3 %v481_v61  ;;  %v764_v61 = vpop.f32.mrf.mxu1  ;;  %v762_v34 = vadd.f32 %v761_v47, %v648_v5 }
 0x157   : > { %v720_v2 = vpop.f32.mrf.mxu2 }
 0x158   : > { %v833_v3 = vpop.f32.mrf.mxu3 }
 0x159   : > { %v2351_v4 = vadd.f32 %v833_v3, %v720_v2 }
 0x15c   : > { %900 = vmatmul.f32.gmra.mxu2 %v484_v6  ;;  %v504_v6 = vld [vmem:[%s2208_s23 + $0x2b0] sm:$0xff] }
 0x15d   : > { %1013 = vmatmul.f32.gmra.mxu3 %v485_v7  ;;  %v767_v11 = vpop.f32.mrf.mxu1 }
 0x15f   : > { %v853_v13 = vpop.f32.mrf.mxu2 }
 0x160   : > { %v966_v14 = vpop.f32.mrf.mxu3  ;;  %v854_v15 = vadd.f32 %v853_v13, %v741_v9  ;;  %v505_v9 = vld [vmem:[%s2208_s23 + $0x2b8] sm:$0xff]  ;;  %v1169_v13 = vld [vmem:[%s2200_s30 + $0x40] sm:$0xff] }
 0x161   : > { %1382 = vmatmul.f32.gmra.mxu1 %v1169_v13 }
 0x162   : > { %v967_v18 = vadd.f32 %v966_v14, %v854_v15 }
 0x164   : > { %903 = vmatmul.f32.gmra.mxu2 %v488_v16  ;;  %1245 = vmatmul.f32.vlgmr.msrb.gmra.mxu0 %v967_v18  ;;  %v508_v18 = vld [vmem:[%s2208_s23 + $0x2d0] sm:$0xff] }
 0x165   : > { %1016 = vmatmul.f32.gmra.mxu3 %v489_v19  ;;  %v770_v23 = vpop.f32.mrf.mxu1 }
 0x167   : > { %v856_v25 = vpop.f32.mrf.mxu2 }
 0x168   : > { %v969_v27 = vpop.f32.mrf.mxu3  ;;  %v857_v28 = vadd.f32 %v856_v25, %v744_v22  ;;  %v651_v22 = vpop.f32.mrf.mxu0  ;;  %v1170_v25 = vld [vmem:[%s2200_s30 + $0x48] sm:$0xff] }
 0x169   : > { %1385 = vmatmul.f32.gmra.mxu1 %v1170_v25  ;;  %v765_v48 = vadd.f32 %v764_v61, %v651_v22  ;;  %v1173_v61 = vld [vmem:[%s2200_s30 + $0x60] sm:$0xff]  ;;  %v529_v22 = vld [vmem:[%s2208_s23 + $0x378] sm:$0xff] }
 0x16a   : > { %v970_v31 = vadd.f32 %v969_v27, %v857_v28 }
 0x16c   : > { %906 = vmatmul.f32.gmra.mxu2 %v492_v29  ;;  %1248 = vmatmul.f32.gmra.mxu0 %v970_v31  ;;  %v512_v31 = vld [vmem:[%s2208_s23 + $0x2f0] sm:$0xff] }
 0x16d   : > { %1019 = vmatmul.f32.gmra.mxu3 %v493_v32  ;;  %v773_v36 = vpop.f32.mrf.mxu1 }
 0x16f   : > { %v859_v38 = vpop.f32.mrf.mxu2 }
 0x170   : > { %v972_v39 = vpop.f32.mrf.mxu3  ;;  %v860_v41 = vadd.f32 %v859_v38, %v747_v33  ;;  %v513_v33 = vld [vmem:[%s2208_s23 + $0x2f8] sm:$0xff]  ;;  %v654_v37 = vpop.f32.mrf.mxu0  ;;  %v1171_v38 = vld [vmem:[%s2200_s30 + $0x50] sm:$0xff] }
 0x171   : > { %1388 = vmatmul.f32.gmra.mxu1 %v1171_v38  ;;  %v768_v62 = vadd.f32 %v767_v11, %v654_v37  ;;  %v1174_v11 = vld [vmem:[%s2200_s30 + $0x68] sm:$0xff] }
 0x172   : > { %v973_v43 = vadd.f32 %v972_v39, %v860_v41 }
 0x174   : > { %909 = vmatmul.f32.gmra.mxu2 %v496_v42  ;;  %1251 = vmatmul.f32.gmra.mxu0 %v973_v43  ;;  %v516_v43 = vld [vmem:[%s2208_s23 + $0x310] sm:$0xff] }
 0x175   : > { %1022 = vmatmul.f32.gmra.mxu3 %v497_v45  ;;  %v776_v47 = vpop.f32.mrf.mxu1 }
 0x177   : > { %v862_v51 = vpop.f32.mrf.mxu2 }
 0x178   : > { %v975_v52 = vpop.f32.mrf.mxu3  ;;  %v863_v55 = vadd.f32 %v862_v51, %v750_v46  ;;  %v517_v46 = vld [vmem:[%s2208_s23 + $0x318] sm:$0xff]  ;;  %v657_v51 = vpop.f32.mrf.mxu0 }
 0x179   : > { %1391 = vmatmul.f32.gmra.mxu1 %v1172_v50  ;;  %v771_v13 = vadd.f32 %v770_v23, %v657_v51  ;;  %v1175_v23 = vld [vmem:[%s2200_s30 + $0x70] sm:$0xff] }
 0x17a   : > { %v976_v57 = vadd.f32 %v975_v52, %v863_v55 }
 0x17c   : > { %912 = vmatmul.f32.gmra.mxu2 %v500_v56  ;;  %1254 = vmatmul.f32.gmra.mxu0 %v976_v57  ;;  %v520_v57 = vld [vmem:[%s2208_s23 + $0x330] sm:$0xff] }
 0x17d   : > { %1025 = vmatmul.f32.gmra.mxu3 %v501_v58 }
 0x17f   : > { %v865_v1 = vpop.f32.mrf.mxu2 }
 0x180   : > { %v978_v2 = vpop.f32.mrf.mxu3  ;;  %v866_v3 = vadd.f32 %v865_v1, %v753_v60  ;;  %v521_v60 = vld [vmem:[%s2208_s23 + $0x338] sm:$0xff]  ;;  %v779_v1 = vpop.f32.mrf.mxu1 }
 0x181   : > { %1394 = vmatmul.f32.gmra.mxu1 %v1173_v61 }
 0x182   : > { %v979_v7 = vadd.f32 %v978_v2, %v866_v3 }
 0x184   : > { %915 = vmatmul.f32.gmra.mxu2 %v504_v6  ;;  %1257 = vmatmul.f32.gmra.mxu0 %v979_v7  ;;  %v660_v6 = vpop.f32.mrf.mxu0  ;;  %v524_v7 = vld [vmem:[%s2208_s23 + $0x350] sm:$0xff] }
 0x185   : > { %1028 = vmatmul.f32.gmra.mxu3 %v505_v9  ;;  %v774_v25 = vadd.f32 %v773_v36, %v660_v6  ;;  %v544_v6 = vld [vmem:[%s2208_s23 + $0x3f0] sm:$0xff] }
 0x187   : > { %v868_v14 = vpop.f32.mrf.mxu2 }
 0x188   : > { %v981_v15 = vpop.f32.mrf.mxu3  ;;  %v869_v16 = vadd.f32 %v868_v14, %v756_v12  ;;  %v525_v12 = vld [vmem:[%s2208_s23 + $0x358] sm:$0xff] }
 0x189   : > { %1397 = vmatmul.f32.gmra.mxu1 %v1174_v11 }
 0x18a   : > { %v982_v19 = vadd.f32 %v981_v15, %v869_v16 }
 0x18c   : > { %918 = vmatmul.f32.gmra.mxu2 %v508_v18  ;;  %1260 = vmatmul.f32.gmra.mxu0 %v982_v19  ;;  %v528_v18 = vld [vmem:[%s2208_s23 + $0x370] sm:$0xff]  ;;  %v782_v19 = vpop.f32.mrf.mxu1 }
 0x18d   : > { %1031 = vmatmul.f32.gmra.mxu3 %v509_v21 }
 0x18f   : > { %v871_v27 = vpop.f32.mrf.mxu2 }
 0x190   : > { %v984_v28 = vpop.f32.mrf.mxu3  ;;  %v872_v29 = vadd.f32 %v871_v27, %v759_v24  ;;  %v663_v24 = vpop.f32.mrf.mxu0 }
 0x191   : > { %1400 = vmatmul.f32.gmra.mxu1 %v1175_v23  ;;  %v777_v37 = vadd.f32 %v776_v47, %v663_v24  ;;  %v1177_v47 = vld [vmem:[%s2200_s30 + $0x80] sm:$0xff] }
 0x192   : > { %v985_v32 = vadd.f32 %v984_v28, %v872_v29  ;;  %v2405_v24 = vld [vmem:[%s2546_s4] ss:$0 sm:$0xff] }
 0x194   : > { %921 = vmatmul.f32.gmra.mxu2 %v512_v31  ;;  %1263 = vmatmul.f32.gmra.mxu0 %v985_v32  ;;  %v532_v31 = vld [vmem:[%s2208_s23 + $0x390] sm:$0xff] }
 0x195   : > { %1034 = vmatmul.f32.gmra.mxu3 %v513_v33  ;;  %v533_v33 = vld [vmem:[%s2208_s23 + $0x398] sm:$0xff] }
 0x197   : > { %v874_v39 = vpop.f32.mrf.mxu2 }
 0x198   : > { %v987_v41 = vpop.f32.mrf.mxu3  ;;  %v875_v42 = vadd.f32 %v874_v39, %v762_v34  ;;  %v785_v34 = vpop.f32.mrf.mxu1  ;;  %v1176_v39 = vld [vmem:[%s2200_s30 + $0x78] sm:$0xff] }
 0x199   : > { %v666_v38 = vpop.f32.mrf.mxu0  ;;  %1403 = vmatmul.f32.gmra.mxu1 %v1176_v39 }
 0x19a   : > { %v988_v45 = vadd.f32 %v987_v41, %v875_v42  ;;  %v780_v50 = vadd.f32 %v779_v1, %v666_v38  ;;  %v1178_v1 = vld [vmem:[%s2200_s30 + $0x88] sm:$0xff] }
 0x19c   : > { %924 = vmatmul.f32.gmra.mxu2 %v516_v43  ;;  %1266 = vmatmul.f32.gmra.mxu0 %v988_v45  ;;  %v536_v43 = vld [vmem:[%s2208_s23 + $0x3b0] sm:$0xff] }
 0x19d   : > { %1037 = vmatmul.f32.gmra.mxu3 %v517_v46  ;;  %v537_v46 = vld [vmem:[%s2208_s23 + $0x3b8] sm:$0xff] }
 0x19f   : > { %v877_v52 = vpop.f32.mrf.mxu2 }
 0x1a0   : > { %v990_v55 = vpop.f32.mrf.mxu3  ;;  %v878_v56 = vadd.f32 %v877_v52, %v765_v48  ;;  %v1359_v48 = vpop.f32.mrf.mxu1 }
 0x1a1   : > { %v669_v51 = vpop.f32.mrf.mxu0  ;;  %1406 = vmatmul.f32.gmra.mxu1 %v1177_v47 }
 0x1a2   : > { %v991_v58 = vadd.f32 %v990_v55, %v878_v56  ;;  %v783_v61 = vadd.f32 %v782_v19, %v669_v51 }
 0x1a4   : > { %927 = vmatmul.f32.gmra.mxu2 %v520_v57  ;;  %1269 = vmatmul.f32.gmra.mxu0 %v991_v58  ;;  %v540_v57 = vld [vmem:[%s2208_s23 + $0x3d0] sm:$0xff] }
 0x1a5   : > { %1040 = vmatmul.f32.gmra.mxu3 %v521_v60  ;;  %v541_v60 = vld [vmem:[%s2208_s23 + $0x3d8] sm:$0xff] }
 0x1a7   : > { %v880_v2 = vpop.f32.mrf.mxu2 }
 0x1a8   : > { %v993_v3 = vpop.f32.mrf.mxu3  ;;  %v881_v5 = vadd.f32 %v880_v2, %v768_v62  ;;  %v1362_v62 = vpop.f32.mrf.mxu1 }
 0x1a9   : > { %1409 = vmatmul.f32.gmra.mxu1 %v1178_v1 }
 0x1aa   : > { %v994_v9 = vadd.f32 %v993_v3, %v881_v5 }
 0x1ac   : > { %930 = vmatmul.f32.gmra.mxu2 %v524_v7  ;;  %1272 = vmatmul.f32.gmra.mxu0 %v994_v9  ;;  %v672_v7 = vpop.f32.mrf.mxu0 }
 0x1ad   : > { %1043 = vmatmul.f32.gmra.mxu3 %v525_v12  ;;  %v545_v12 = vld [vmem:[%s2208_s23 + $0x3f8] sm:$0xff]  ;;  %v786_v11 = vadd.f32 %v785_v34, %v672_v7  ;;  %v1181_v34 = vld [vmem:[%s2200_s30 + $0xa0] sm:$0xff] }
 0x1ae   : > { %v1184_v7 = vld [vmem:[%s2200_s30 + $0xb8] sm:$0xff] }
 0x1af   : > { %v883_v14 = vpop.f32.mrf.mxu2 }
 0x1b0   : > { %v996_v15 = vpop.f32.mrf.mxu3  ;;  %v884_v16 = vadd.f32 %v883_v14, %v771_v13  ;;  %v1365_v13 = vpop.f32.mrf.mxu1  ;;  %v1179_v14 = vld [vmem:[%s2200_s30 + $0x90] sm:$0xff] }
 0x1b1   : > { %1412 = vmatmul.f32.gmra.mxu1 %v1179_v14 }
 0x1b2   : > { %v997_v21 = vadd.f32 %v996_v15, %v884_v16 }
 0x1b4   : > { %933 = vmatmul.f32.gmra.mxu2 %v528_v18  ;;  %1275 = vmatmul.f32.gmra.mxu0 %v997_v21 }
 0x1b5   : > { %1046 = vmatmul.f32.gmra.mxu3 %v529_v22  ;;  %v1180_v22 = vld [vmem:[%s2200_s30 + $0x98] sm:$0xff] }
 0x1b7   : > { %v886_v27 = vpop.f32.mrf.mxu2 }
 0x1b8   : > { %v999_v28 = vpop.f32.mrf.mxu3  ;;  %v887_v29 = vadd.f32 %v886_v27, %v774_v25  ;;  %v1368_v21 = vpop.f32.mrf.mxu1 }
 0x1b9   : > { %1415 = vmatmul.f32.gmra.mxu1 %v1180_v22 }
 0x1ba   : > { %v1000_v32 = vadd.f32 %v999_v28, %v887_v29 }
 0x1bc   : > { %936 = vmatmul.f32.gmra.mxu2 %v532_v31  ;;  %1278 = vmatmul.f32.gmra.mxu0 %v1000_v32 }
 0x1bd   : > { %1049 = vmatmul.f32.gmra.mxu3 %v533_v33 }
 0x1bf   : > { %v889_v36 = vpop.f32.mrf.mxu2 }
 0x1c0   : > { %v1002_v41 = vpop.f32.mrf.mxu3  ;;  %v890_v42 = vadd.f32 %v889_v36, %v777_v37  ;;  %v1371_v32 = vpop.f32.mrf.mxu1 }
 0x1c1   : > { %1418 = vmatmul.f32.gmra.mxu1 %v1181_v34 }
 0x1c2   : > { %v1003_v45 = vadd.f32 %v1002_v41, %v890_v42 }
 0x1c4   : > { %939 = vmatmul.f32.gmra.mxu2 %v536_v43  ;;  %1281 = vmatmul.f32.gmra.mxu0 %v1003_v45 }
 0x1c5   : > { %1052 = vmatmul.f32.gmra.mxu3 %v537_v46  ;;  %v1182_v46 = vld [vmem:[%s2200_s30 + $0xa8] sm:$0xff] }
 0x1c7   : > { %v892_v52 = vpop.f32.mrf.mxu2 }
 0x1c8   : > { %v1005_v55 = vpop.f32.mrf.mxu3  ;;  %v893_v56 = vadd.f32 %v892_v52, %v780_v50  ;;  %v1374_v43 = vpop.f32.mrf.mxu1 }
 0x1c9   : > { %1421 = vmatmul.f32.gmra.mxu1 %v1182_v46 }
 0x1ca   : > { %v1006_v58 = vadd.f32 %v1005_v55, %v893_v56 }
 0x1cc   : > { %942 = vmatmul.f32.gmra.mxu2 %v540_v57  ;;  %1284 = vmatmul.f32.gmra.mxu0 %v1006_v58  ;;  %v1183_v58 = vld [vmem:[%s2200_s30 + $0xb0] sm:$0xff] }
 0x1cd   : > { %1055 = vmatmul.f32.gmra.mxu3 %v541_v60 }
 0x1cf   : > { %v895_v2 = vpop.f32.mrf.mxu2 }
 0x1d0   : > { %v1008_v3 = vpop.f32.mrf.mxu3  ;;  %v896_v5 = vadd.f32 %v895_v2, %v783_v61  ;;  %v1377_v56 = vpop.f32.mrf.mxu1 }
 0x1d1   : > { %1424 = vmatmul.f32.gmra.mxu1 %v1183_v58 }
 0x1d2   : > { %v1009_v9 = vadd.f32 %v1008_v3, %v896_v5 }
 0x1d4   : > { %945 = vmatmul.f32.gmra.mxu2 %v544_v6  ;;  %1287 = vmatmul.f32.gmra.mxu0 %v1009_v9 }
 0x1d5   : > { %1058 = vmatmul.f32.gmra.mxu3 %v545_v12 }
 0x1d7   : > { %v898_v15 = vpop.f32.mrf.mxu2 }
 0x1d8   : > { %v1011_v16 = vpop.f32.mrf.mxu3  ;;  %v899_v18 = vadd.f32 %v898_v15, %v786_v11  ;;  %v1380_v5 = vpop.f32.mrf.mxu1 }
 0x1d9   : > { %1427 = vmatmul.f32.gmra.mxu1 %v1184_v7 }
 0x1da   : > { %v1012_v19 = vadd.f32 %v1011_v16, %v899_v18 }
 0x1dc   : > { %1290 = vmatmul.f32.gmra.mxu0 %v1012_v19  ;;  %v1185_v19 = vld [vmem:[%s2200_s30 + $0xc0] sm:$0xff] }
 0x1df   : > { %v901_v25 = vpop.f32.mrf.mxu2 }
 0x1e0   : > { %v1014_v23 = vpop.f32.mrf.mxu3  ;;  %v902_v27 = vadd.f32 %v901_v25, %v2266_v54  ;;  %v1383_v16 = vpop.f32.mrf.mxu1 }
 0x1e1   : > { %v1246_v28 = vpop.f32.mrf.mxu0  ;;  %1430 = vmatmul.f32.gmra.mxu1 %v1185_v19 }
 0x1e2   : > { %v1015_v29 = vadd.f32 %v1014_v23, %v902_v27  ;;  %v1247_v31 = vadd.f32 %v2405_v24, %v1246_v28 }
 0x1e4   : > { %v1360_v33 = vadd.f32 %v1359_v48, %v1247_v31  ;;  %1293 = vmatmul.f32.gmra.mxu0 %v1015_v29 }
 0x1e6   : > { %v1455_v37 = vmax.f32 %v1360_v33, 0.0  ;;  %v1186_v33 = vld [vmem:[%s2200_s30 + $0xc8] sm:$0xff] }
 0x1e7   : > { %v904_v38 = vpop.f32.mrf.mxu2 }
 0x1e8   : > { %1487 = vst [vmem:[%s2412_s6] sm:$0xff] %v1455_v37  ;;  %v905_v54 = vadd.f32 %v904_v38, %v2272_v63  ;;  %v1017_v39 = vpop.f32.mrf.mxu3  ;;  %v1386_v29 = vpop.f32.mrf.mxu1 }
 0x1e9   : > { %v1249_v36 = vpop.f32.mrf.mxu0  ;;  %1433 = vmatmul.f32.gmra.mxu1 %v1186_v33 }
 0x1ea   : > { %v1018_v41 = vadd.f32 %v1017_v39, %v905_v54  ;;  %v1250_v42 = vadd.f32 %v2405_v24, %v1249_v36 }
 0x1ec   : > { %v1363_v45 = vadd.f32 %v1362_v62, %v1250_v42  ;;  %1296 = vmatmul.f32.gmra.mxu0 %v1018_v41  ;;  %v1187_v42 = vld [vmem:[%s2200_s30 + $0xd0] sm:$0xff] }
 0x1ee   : > { %v1456_v48 = vmax.f32 %v1363_v45, 0.0 }
 0x1ef   : > { %v907_v50 = vpop.f32.mrf.mxu2 }
 0x1f0   : > { %1488 = vst [vmem:[%s2412_s6 + $0x8] sm:$0xff] %v1456_v48  ;;  %v908_v47 = vadd.f32 %v907_v50, %v2278_v8  ;;  %v1020_v51 = vpop.f32.mrf.mxu3  ;;  %v1389_v36 = vpop.f32.mrf.mxu1 }
 0x1f1   : > { %v1252_v52 = vpop.f32.mrf.mxu0  ;;  %1436 = vmatmul.f32.gmra.mxu1 %v1187_v42 }
 0x1f2   : > { %v1021_v63 = vadd.f32 %v1020_v51, %v908_v47  ;;  %v1253_v55 = vadd.f32 %v2405_v24, %v1252_v52 }
 0x1f4   : > { %v1366_v57 = vadd.f32 %v1365_v13, %v1253_v55  ;;  %1299 = vmatmul.f32.gmra.mxu0 %v1021_v63  ;;  %v1188_v63 = vld [vmem:[%s2200_s30 + $0xd8] sm:$0xff] }
 0x1f6   : > { %v1457_v60 = vmax.f32 %v1366_v57, 0.0 }
 0x1f7   : > { %v910_v62 = vpop.f32.mrf.mxu2 }
 0x1f8   : > { %1489 = vst [vmem:[%s2412_s6 + $0x10] sm:$0xff] %v1457_v60  ;;  %v911_v61 = vadd.f32 %v910_v62, %v2284_v17  ;;  %v1023_v1 = vpop.f32.mrf.mxu3  ;;  %v1392_v51 = vpop.f32.mrf.mxu1 }
 0x1f9   : > { %v1255_v2 = vpop.f32.mrf.mxu0  ;;  %1439 = vmatmul.f32.gmra.mxu1 %v1188_v63 }
 0x1fa   : > { %v1024_v8 = vadd.f32 %v1023_v1, %v911_v61  ;;  %v1256_v3 = vadd.f32 %v2405_v24, %v1255_v2  ;;  %v1189_v2 = vld [vmem:[%s2200_s30 + $0xe0] sm:$0xff] }
 0x1fc   : > { %v1369_v6 = vadd.f32 %v1368_v21, %v1256_v3  ;;  %1302 = vmatmul.f32.gmra.mxu0 %v1024_v8 }
 0x1fe   : > { %v1458_v9 = vmax.f32 %v1369_v6, 0.0 }
 0x1ff   : > { %v913_v12 = vpop.f32.mrf.mxu2 }
 0x200   : > { %1490 = vst [vmem:[%s2412_s6 + $0x18] sm:$0xff] %v1458_v9  ;;  %v914_v13 = vadd.f32 %v913_v12, %v2290_v26  ;;  %v1026_v11 = vpop.f32.mrf.mxu3  ;;  %v1395_v61 = vpop.f32.mrf.mxu1 }
 0x201   : > { %v1258_v14 = vpop.f32.mrf.mxu0  ;;  %1442 = vmatmul.f32.gmra.mxu1 %v1189_v2 }
 0x202   : > { %v1027_v17 = vadd.f32 %v1026_v11, %v914_v13  ;;  %v1259_v15 = vadd.f32 %v2405_v24, %v1258_v14  ;;  %v1190_v11 = vld [vmem:[%s2200_s30 + $0xe8] sm:$0xff] }
 0x204   : > { %v1372_v18 = vadd.f32 %v1371_v32, %v1259_v15  ;;  %1305 = vmatmul.f32.gmra.mxu0 %v1027_v17 }
 0x206   : > { %v1459_v21 = vmax.f32 %v1372_v18, 0.0 }
 0x207   : > { %v916_v22 = vpop.f32.mrf.mxu2 }
 0x208   : > { %1491 = vst [vmem:[%s2412_s6 + $0x20] sm:$0xff] %v1459_v21  ;;  %v917_v25 = vadd.f32 %v916_v22, %v2296_v35  ;;  %v1029_v23 = vpop.f32.mrf.mxu3  ;;  %v1398_v12 = vpop.f32.mrf.mxu1 }
 0x209   : > { %v1261_v27 = vpop.f32.mrf.mxu0  ;;  %1445 = vmatmul.f32.gmra.mxu1 %v1190_v11 }
 0x20a   : > { %v1030_v26 = vadd.f32 %v1029_v23, %v917_v25  ;;  %v1262_v28 = vadd.f32 %v2405_v24, %v1261_v27  ;;  %v1191_v25 = vld [vmem:[%s2200_s30 + $0xf0] sm:$0xff] }
 0x20c   : > { %v1375_v31 = vadd.f32 %v1374_v43, %v1262_v28  ;;  %1308 = vmatmul.f32.gmra.mxu0 %v1030_v26 }
 0x20e   : > { %v1460_v32 = vmax.f32 %v1375_v31, 0.0 }
 0x20f   : > { %v919_v34 = vpop.f32.mrf.mxu2 }
 0x210   : > { %1492 = vst [vmem:[%s2412_s6 + $0x28] sm:$0xff] %v1460_v32  ;;  %v920_v37 = vadd.f32 %v919_v34, %v2302_v44  ;;  %v1032_v38 = vpop.f32.mrf.mxu3  ;;  %v1401_v21 = vpop.f32.mrf.mxu1  ;;  %v1192_v34 = vld [vmem:[%s2200_s30 + $0xf8] sm:$0xff] }
 0x211   : > { %v1264_v54 = vpop.f32.mrf.mxu0  ;;  %1448 = vmatmul.f32.gmra.mxu1 %v1191_v25 }
 0x212   : > { %v1033_v35 = vadd.f32 %v1032_v38, %v920_v37  ;;  %v1265_v39 = vadd.f32 %v2405_v24, %v1264_v54 }
 0x214   : > { %v1378_v41 = vadd.f32 %v1377_v56, %v1265_v39  ;;  %1311 = vmatmul.f32.gmra.mxu0 %v1033_v35 }
 0x216   : > { %v1461_v43 = vmax.f32 %v1378_v41, 0.0 }
 0x217   : > { %v922_v45 = vpop.f32.mrf.mxu2 }
 0x218   : > { %1493 = vst [vmem:[%s2412_s6 + $0x30] sm:$0xff] %v1461_v43  ;;  %v923_v46 = vadd.f32 %v922_v45, %v2308_v53  ;;  %v1035_v48 = vpop.f32.mrf.mxu3  ;;  %v1404_v33 = vpop.f32.mrf.mxu1 }
 0x219   : > { %v1267_v50 = vpop.f32.mrf.mxu0  ;;  %1451 = vmatmul.f32.gmra.mxu1 %v1192_v34 }
 0x21a   : > { %v1036_v44 = vadd.f32 %v1035_v48, %v923_v46  ;;  %v1268_v47 = vadd.f32 %v2405_v24, %v1267_v50 }
 0x21c   : > { %v1381_v52 = vadd.f32 %v1380_v5, %v1268_v47  ;;  %1314 = vmatmul.f32.gmra.mxu0 %v1036_v44 }
 0x21e   : > { %v1462_v55 = vmax.f32 %v1381_v52, 0.0 }
 0x21f   : > { %v925_v56 = vpop.f32.mrf.mxu2 }
 0x220   : > { %1494 = vst [vmem:[%s2412_s6 + $0x38] sm:$0xff] %v1462_v55  ;;  %v926_v57 = vadd.f32 %v925_v56, %v2314_v0  ;;  %v1038_v58 = vpop.f32.mrf.mxu3  ;;  %v1407_v41 = vpop.f32.mrf.mxu1 }
 0x221   : > { %v1270_v60 = vpop.f32.mrf.mxu0 }
 0x222   : > { %v1039_v53 = vadd.f32 %v1038_v58, %v926_v57  ;;  %v1271_v62 = vadd.f32 %v2405_v24, %v1270_v60 }
 0x224   : > { %v1384_v1 = vadd.f32 %v1383_v16, %v1271_v62  ;;  %1317 = vmatmul.f32.gmra.mxu0 %v1039_v53 }
 0x226   : > { %v1463_v8 = vmax.f32 %v1384_v1, 0.0 }
 0x227   : > { %v928_v3 = vpop.f32.mrf.mxu2 }
 0x228   : > { %1495 = vst [vmem:[%s2412_s6 + $0x40] sm:$0xff] %v1463_v8  ;;  %v929_v5 = vadd.f32 %v928_v3, %v2320_v10  ;;  %v1041_v6 = vpop.f32.mrf.mxu3 }
 0x229   : > { %v1273_v7 = vpop.f32.mrf.mxu0 }
 0x22a   : > { %v1042_v0 = vadd.f32 %v1041_v6, %v929_v5  ;;  %v1274_v9 = vadd.f32 %v2405_v24, %v1273_v7 }
 0x22c   : > { %v1387_v13 = vadd.f32 %v1386_v29, %v1274_v9  ;;  %1320 = vmatmul.f32.gmra.mxu0 %v1042_v0 }
 0x22e   : > { %v1464_v14 = vmax.f32 %v1387_v13, 0.0 }
 0x22f   : > { %v931_v17 = vpop.f32.mrf.mxu2 }
 0x230   : > { %1496 = vst [vmem:[%s2412_s6 + $0x48] sm:$0xff] %v1464_v14  ;;  %v932_v15 = vadd.f32 %v931_v17, %v2326_v20  ;;  %v1044_v16 = vpop.f32.mrf.mxu3 }
 0x231   : > { %v1276_v18 = vpop.f32.mrf.mxu0 }
 0x232   : > { %v1045_v10 = vadd.f32 %v1044_v16, %v932_v15  ;;  %v1277_v19 = vadd.f32 %v2405_v24, %v1276_v18 }
 0x234   : > { %v1390_v22 = vadd.f32 %v1389_v36, %v1277_v19  ;;  %1323 = vmatmul.f32.gmra.mxu0 %v1045_v10 }
 0x236   : > { %v1465_v23 = vmax.f32 %v1390_v22, 0.0 }
 0x237   : > { %v934_v27 = vpop.f32.mrf.mxu2 }
 0x238   : > { %1497 = vst [vmem:[%s2412_s6 + $0x50] sm:$0xff] %v1465_v23  ;;  %v935_v26 = vadd.f32 %v934_v27, %v2332_v30  ;;  %v1047_v28 = vpop.f32.mrf.mxu3 }
 0x239   : > { %v1279_v29 = vpop.f32.mrf.mxu0 }
 0x23a   : > { %v1048_v20 = vadd.f32 %v1047_v28, %v935_v26  ;;  %v1280_v31 = vadd.f32 %v2405_v24, %v1279_v29 }
 0x23c   : > { %v1393_v32 = vadd.f32 %v1392_v51, %v1280_v31  ;;  %1326 = vmatmul.f32.gmra.mxu0 %v1048_v20  ;;  %v1410_v51 = vpop.f32.mrf.mxu1 }
 0x23e   : > { %v1466_v37 = vmax.f32 %v1393_v32, 0.0 }
 0x23f   : > { %v937_v38 = vpop.f32.mrf.mxu2 }
 0x240   : > { %1498 = vst [vmem:[%s2412_s6 + $0x58] sm:$0xff] %v1466_v37  ;;  %v938_v54 = vadd.f32 %v937_v38, %v2336_v40  ;;  %v1050_v35 = vpop.f32.mrf.mxu3 }
 0x241   : > { %v1282_v39 = vpop.f32.mrf.mxu0 }
 0x242   : > { %v1051_v36 = vadd.f32 %v1050_v35, %v938_v54  ;;  %v1283_v30 = vadd.f32 %v2405_v24, %v1282_v39 }
 0x244   : > { %v1396_v42 = vadd.f32 %v1395_v61, %v1283_v30  ;;  %1329 = vmatmul.f32.gmra.mxu0 %v1051_v36  ;;  %v1413_v61 = vpop.f32.mrf.mxu1 }
 0x246   : > { %v1467_v43 = vmax.f32 %v1396_v42, 0.0 }
 0x247   : > { %v940_v45 = vpop.f32.mrf.mxu2 }
 0x248   : > { %1499 = vst [vmem:[%s2412_s6 + $0x60] sm:$0xff] %v1467_v43  ;;  %v941_v46 = vadd.f32 %v940_v45, %v2341_v49  ;;  %v1053_v48 = vpop.f32.mrf.mxu3 }
 0x249   : > { %v1285_v50 = vpop.f32.mrf.mxu0 }
 0x24a   : > { %v1054_v44 = vadd.f32 %v1053_v48, %v941_v46  ;;  %v1286_v47 = vadd.f32 %v2405_v24, %v1285_v50 }
 0x24c   : > { %v1399_v40 = vadd.f32 %v1398_v12, %v1286_v47  ;;  %1332 = vmatmul.f32.gmra.mxu0 %v1054_v44  ;;  %v1416_v0 = vpop.f32.mrf.mxu1 }
 0x24e   : > { %v1468_v52 = vmax.f32 %v1399_v40, 0.0 }
 0x24f   : > { %v943_v63 = vpop.f32.mrf.mxu2 }
 0x250   : > { %1500 = vst [vmem:[%s2412_s6 + $0x68] sm:$0xff] %v1468_v52  ;;  %v944_v55 = vadd.f32 %v943_v63, %v2346_v59  ;;  %v1056_v56 = vpop.f32.mrf.mxu3 }
 0x251   : > { %v1288_v57 = vpop.f32.mrf.mxu0 }
 0x252   : > { %v1057_v58 = vadd.f32 %v1056_v56, %v944_v55  ;;  %v1289_v49 = vadd.f32 %v2405_v24, %v1288_v57 }
 0x254   : > { %v1402_v60 = vadd.f32 %v1401_v21, %v1289_v49  ;;  %1335 = vmatmul.f32.gmra.mxu0 %v1057_v58  ;;  %v1419_v14 = vpop.f32.mrf.mxu1 }
 0x256   : > { %v1469_v53 = vmax.f32 %v1402_v60, 0.0 }
 0x257   : > { %v946_v62 = vpop.f32.mrf.mxu2 }
 0x258   : > { %1501 = vst [vmem:[%s2412_s6 + $0x70] sm:$0xff] %v1469_v53  ;;  %v947_v1 = vadd.f32 %v946_v62, %v2351_v4  ;;  %v1059_v2 = vpop.f32.mrf.mxu3 }
 0x259   : > { %v1291_v8 = vpop.f32.mrf.mxu0 }
 0x25a   : > { %v1060_v3 = vadd.f32 %v1059_v2, %v947_v1  ;;  %v1292_v59 = vadd.f32 %v2405_v24, %v1291_v8 }
 0x25c   : > { %v1405_v5 = vadd.f32 %v1404_v33, %v1292_v59  ;;  %1338 = vmatmul.f32.gmra.mxu0 %v1060_v3  ;;  %v1422_v19 = vpop.f32.mrf.mxu1 }
 0x25e   : > { %v1470_v6 = vmax.f32 %v1405_v5, 0.0 }
 0x260   : > { %1502 = vst [vmem:[%s2412_s6 + $0x78] sm:$0xff] %v1470_v6 }
 0x261   : > { %v1294_v7 = vpop.f32.mrf.mxu0 }
 0x262   : > { %v1295_v9 = vadd.f32 %v2405_v24, %v1294_v7 }
 0x264   : > { %v1408_v12 = vadd.f32 %v1407_v41, %v1295_v9  ;;  %v1425_v26 = vpop.f32.mrf.mxu1 }
 0x266   : > { %v1471_v13 = vmax.f32 %v1408_v12, 0.0 }
 0x268   : > { %1503 = vst [vmem:[%s2412_s6 + $0x80] sm:$0xff] %v1471_v13 }
 0x269   : > { %v1297_v11 = vpop.f32.mrf.mxu0 }
 0x26a   : > { %v1298_v4 = vadd.f32 %v2405_v24, %v1297_v11 }
 0x26c   : > { %v1411_v17 = vadd.f32 %v1410_v51, %v1298_v4  ;;  %v1428_v32 = vpop.f32.mrf.mxu1 }
 0x26e   : > { %v1472_v15 = vmax.f32 %v1411_v17, 0.0 }
 0x270   : > { %1504 = vst [vmem:[%s2412_s6 + $0x88] sm:$0xff] %v1472_v15 }
 0x271   : > { %v1300_v16 = vpop.f32.mrf.mxu0 }
 0x272   : > { %v1301_v18 = vadd.f32 %v2405_v24, %v1300_v16 }
 0x274   : > { %v1414_v10 = vadd.f32 %v1413_v61, %v1301_v18  ;;  %v1431_v39 = vpop.f32.mrf.mxu1 }
 0x276   : > { %v1473_v21 = vmax.f32 %v1414_v10, 0.0 }
 0x278   : > { %1505 = vst [vmem:[%s2412_s6 + $0x90] sm:$0xff] %v1473_v21 }
 0x279   : > { %v1303_v22 = vpop.f32.mrf.mxu0 }
 0x27a   : > { %v1304_v25 = vadd.f32 %v2405_v24, %v1303_v22 }
 0x27c   : > { %v1417_v23 = vadd.f32 %v1416_v0, %v1304_v25  ;;  %v1434_v45 = vpop.f32.mrf.mxu1 }
 0x27e   : > { %v1474_v27 = vmax.f32 %v1417_v23, 0.0 }
 0x280   : > { %1506 = vst [vmem:[%s2412_s6 + $0x98] sm:$0xff] %v1474_v27 }
 0x281   : > { %v1306_v28 = vpop.f32.mrf.mxu0 }
 0x282   : > { %v1307_v29 = vadd.f32 %v2405_v24, %v1306_v28 }
 0x284   : > { %v1420_v20 = vadd.f32 %v1419_v14, %v1307_v29  ;;  %v1437_v40 = vpop.f32.mrf.mxu1 }
 0x286   : > { %v1475_v31 = vmax.f32 %v1420_v20, 0.0 }
 0x288   : > { %1507 = vst [vmem:[%s2412_s6 + $0xa0] sm:$0xff] %v1475_v31 }
 0x289   : > { %v1309_v33 = vpop.f32.mrf.mxu0 }
 0x28a   : > { %v1310_v34 = vadd.f32 %v2405_v24, %v1309_v33 }
 0x28c   : > { %v1423_v37 = vadd.f32 %v1422_v19, %v1310_v34  ;;  %v1440_v57 = vpop.f32.mrf.mxu1 }
 0x28e   : > { %v1476_v38 = vmax.f32 %v1423_v37, 0.0 }
 0x290   : > { %1508 = vst [vmem:[%s2412_s6 + $0xa8] sm:$0xff] %v1476_v38 }
 0x291   : > { %v1312_v54 = vpop.f32.mrf.mxu0 }
 0x292   : > { %v1313_v35 = vadd.f32 %v2405_v24, %v1312_v54 }
 0x294   : > { %v1426_v36 = vadd.f32 %v1425_v26, %v1313_v35  ;;  %v1443_v61 = vpop.f32.mrf.mxu1 }
 0x296   : > { %v1477_v30 = vmax.f32 %v1426_v36, 0.0 }
 0x298   : > { %1509 = vst [vmem:[%s2412_s6 + $0xb0] sm:$0xff] %v1477_v30 }
 0x299   : > { %v1315_v41 = vpop.f32.mrf.mxu0 }
 0x29a   : > { %v1316_v42 = vadd.f32 %v2405_v24, %v1315_v41 }
 0x29c   : > { %v1429_v43 = vadd.f32 %v1428_v32, %v1316_v42  ;;  %v1446_v5 = vpop.f32.mrf.mxu1 }
 0x29e   : > { %v1478_v46 = vmax.f32 %v1429_v43, 0.0 }
 0x2a0   : > { %1510 = vst [vmem:[%s2412_s6 + $0xb8] sm:$0xff] %v1478_v46 }
 0x2a1   : > { %v1318_v48 = vpop.f32.mrf.mxu0 }
 0x2a2   : > { %v1319_v50 = vadd.f32 %v2405_v24, %v1318_v48 }
 0x2a4   : > { %v1432_v44 = vadd.f32 %v1431_v39, %v1319_v50  ;;  %v1449_v13 = vpop.f32.mrf.mxu1 }
 0x2a6   : > { %v1479_v47 = vmax.f32 %v1432_v44, 0.0 }
 0x2a8   : > { %1511 = vst [vmem:[%s2412_s6 + $0xc0] sm:$0xff] %v1479_v47 }
 0x2a9   : > { %v1321_v51 = vpop.f32.mrf.mxu0 }
 0x2aa   : > { %v1322_v52 = vadd.f32 %v2405_v24, %v1321_v51 }
 0x2ac   : > { %v1435_v63 = vadd.f32 %v1434_v45, %v1322_v52  ;;  %v1452_v16 = vpop.f32.mrf.mxu1 }
 0x2ae   : > { %v1480_v55 = vmax.f32 %v1435_v63, 0.0 }
 0x2b0   : > { %1512 = vst [vmem:[%s2412_s6 + $0xc8] sm:$0xff] %v1480_v55 }
 0x2b1   : > { %v1324_v56 = vpop.f32.mrf.mxu0 }
 0x2b2   : > { %v1325_v58 = vadd.f32 %v2405_v24, %v1324_v56 }
 0x2b4   : > { %v1438_v49 = vadd.f32 %v1437_v40, %v1325_v58 }
 0x2b6   : > { %v1481_v60 = vmax.f32 %v1438_v49, 0.0 }
 0x2b8   : > { %1513 = vst [vmem:[%s2412_s6 + $0xd0] sm:$0xff] %v1481_v60 }
 0x2b9   : > { %v1327_v53 = vpop.f32.mrf.mxu0 }
 0x2ba   : > { %v1328_v62 = vadd.f32 %v2405_v24, %v1327_v53 }
 0x2bc   : > { %v1441_v1 = vadd.f32 %v1440_v57, %v1328_v62 }
 0x2be   : > { %v1482_v2 = vmax.f32 %v1441_v1, 0.0 }
 0x2c0   : > { %1514 = vst [vmem:[%s2412_s6 + $0xd8] sm:$0xff] %v1482_v2 }
 0x2c1   : > { %v1330_v8 = vpop.f32.mrf.mxu0 }
 0x2c2   : > { %v1331_v3 = vadd.f32 %v2405_v24, %v1330_v8 }
 0x2c4   : > { %v1444_v59 = vadd.f32 %v1443_v61, %v1331_v3 }
 0x2c6   : > { %v1483_v6 = vmax.f32 %v1444_v59, 0.0 }
 0x2c8   : > { %1515 = vst [vmem:[%s2412_s6 + $0xe0] sm:$0xff] %v1483_v6 }
 0x2c9   : > { %v1333_v7 = vpop.f32.mrf.mxu0 }
 0x2ca   : > { %v1334_v0 = vadd.f32 %v2405_v24, %v1333_v7 }
 0x2cc   : > { %v1447_v9 = vadd.f32 %v1446_v5, %v1334_v0 }
 0x2ce   : > { %v1484_v12 = vmax.f32 %v1447_v9, 0.0 }
 0x2d0   : > { %1516 = vst [vmem:[%s2412_s6 + $0xe8] sm:$0xff] %v1484_v12 }
 0x2d1   : > { %v1336_v11 = vpop.f32.mrf.mxu0 }
 0x2d2   : > { %v1337_v4 = vadd.f32 %v2405_v24, %v1336_v11 }
 0x2d4   : > { %v1450_v14 = vadd.f32 %v1449_v13, %v1337_v4 }
 0x2d6   : > { %v1485_v17 = vmax.f32 %v1450_v14, 0.0 }
 0x2d8   : > { %1517 = vst [vmem:[%s2412_s6 + $0xf0] sm:$0xff] %v1485_v17 }
 0x2d9   : > { %v1339_v15 = vpop.f32.mrf.mxu0 }
 0x2da   : > { %v1340_v18 = vadd.f32 %v2405_v24, %v1339_v15 }
 0x2dc   : > { %v1453_v10 = vadd.f32 %v1452_v16, %v1340_v18 }
 0x2de   : > { %v1486_v19 = vmax.f32 %v1453_v10, 0.0 }
 0x2e0   : > { %1518 = vst [vmem:[%s2412_s6 + $0xf8] sm:$0xff] %v1486_v19 }
 0x2e1   : > { %1965 = shalt.err (!%p1962_p0)
}
 0x2e2   : > { %s2040_s3 = smov 128   ;;  %s2041_s30 = smov 8  }
 0x2e3   : > { %1735 = dma.vmem_to_hbm [thread:$0]  (%p2157_p7), %s1533_s10, 4096, %s1535_s7, %s1520_s12, %s2040_s3, %s2040_s3, %s2041_s30  }
 0x2e4 PF: > { %s2572_s0 = sld [smem:[#allocation18_spill]]  ;;  %s1549_s2 = sand.u32 1, %s2012_s18  }
 0x2e5   : > { %p1752_p3 = pnand %p1668_p11, %p2117_p6  ;;  %s1550_s20 = scalar_lea.sflag [#allocation5], %s1549_s2 }
 0x2e7   : > { %p1753_p5 = pneg %p1752_p3 }
 0x2e9   : > { %2007 = dma.done.wait (%p1753_p5), %s1550_s20, 4096  }
 0x2ea   : > { %2009 = vsyncadd (%p1753_p5), %s1550_s20, 4294963200  ;;  %s25_s23 = sadd.s32 1, %s2572_s0   ;;  %s2573_s24 = sld [smem:[#allocation17_spill]] }
 0x2eb   : > { %p22_p9 = scmp.ge.s32.totalorder %s25_s23, 4   ;;  %s2574_s20 = sld [smem:[#allocation20_spill]] }
 0x2ec   : > { %s2575_s28 = sld [smem:[#allocation19_spill]]  ;;  %s2576_s18 = smov %s2016_s19 }
 0x2ed   : > { %s2578_s21 = smov %s2028_s22 }
 0x2ee   :  { %24 = sbr.rel (!%p22_p9) target bundleno = 13 (0xd), region = 115 }
 0x2f0   : > { %s2577_s19 = smov %s2573_s24 }
 0x2f2   : > { %s2579_s22 = smov %s2575_s28 }
 0x2f3   :  { %1556 = vsyncpa [#allocation4], 1 }
 0x2f4   :  { %1558 = vsyncpa [#allocation4 + $0x1], 1 }
 0x2f5   :  { %1559 = vsyncpa [#allocation7], 1 }
 0x2f6   :  { %1561 = vsyncpa [#allocation7 + $0x1], 1 }
 0x2f7   :  { %1562 = vsyncpa [#allocation10], 1 }
 0x2f8   :  { %1563 = vsyncpa [#allocation5], 1 }
 0x2f9   :  { %1565 = vsyncpa [#allocation5 + $0x1], 1 }

</bundles_post_ra>
